<compile_context>
chip_gen: v7x
topology: tpu7x:2x2x1
jax: 0.10.0
libtpu: 0.0.40
codegen_flags: <defaults>
</compile_context>

<pallas_src>
import functools
import inspect
import math

import jax
import jax.numpy as jnp
import numpy as np
from jax import lax
from jax.experimental import pallas as pl
from jax.experimental.pallas import tpu as pltpu


# ----------------------------- in-kernel helpers -----------------------------

_SQRT_2_OVER_PI = math.sqrt(2.0 / math.pi)


def _gelu_tanh(x):
    # tanh approximation of the erf-GELU used by the module (|diff| << test tolerance);
    # tanh lowers to the EUP, cutting VALU pressure on the largest (TQ, I) tensor.
    return 0.5 * x * (1.0 + jnp.tanh(_SQRT_2_OVER_PI * (x + 0.044715 * (x * x * x))))


def _layernorm(x, gamma, beta, eps=1e-12):
    u = jnp.mean(x, axis=-1, keepdims=True)
    xc = x - u
    s = jnp.mean(xc * xc, axis=-1, keepdims=True)
    return gamma * (xc * lax.rsqrt(s + eps)) + beta


# --------------------------------- kernel ------------------------------------

def _bert_audio_layer_kernel(num_heads, head_dim, q_tile, return_probs,
                             x_ref, mask_ref,
                             wq_ref, bq_ref, wk_ref, bk_ref, wv_ref, bv_ref,
                             wo_ref, bo_ref, g1_ref, be1_ref,
                             wi_ref, bi_ref, w2_ref, b2_ref, g2_ref, be2_ref,
                             *outs_and_scratch):
    f32, bf16 = jnp.float32, jnp.bfloat16

    if return_probs:
        out_ref, probs_ref, k_sc, v_sc = outs_and_scratch
    else:
        out_ref, k_sc, v_sc = outs_and_scratch
        probs_ref = None

    qt = pl.program_id(1)

    # ---- K/V projections: once per batch element, cached in bf16 VMEM scratch and reused
    # across all query tiles (the qt grid axis is "arbitrary", so the carry is legal). ----
    @pl.when(qt == 0)
    def _():
        x_full = x_ref[0]                                          # (L, H) bf16
        k = jnp.dot(x_full, wk_ref[...], preferred_element_type=f32) + bk_ref[...]
        v = jnp.dot(x_full, wv_ref[...], preferred_element_type=f32) + bv_ref[...]
        k_sc[...] = k.astype(bf16)
        v_sc[...] = v.astype(bf16)

    # ---- Query tile rows, sliced straight from the resident full-x block. ----
    row0 = pl.multiple_of(qt * q_tile, q_tile)
    x_q_b = x_ref[0, pl.ds(row0, q_tile), :]                       # (TQ, H) bf16
    x_q = x_q_b.astype(f32)                                        # residual/LN path in f32
    mask = mask_ref[0]                                             # (1, L) f32 additive mask

    # Q projection (1/sqrt(head_dim) is folded into Wq and bq by the wrapper).
    q = jnp.dot(x_q_b, wq_ref[...], preferred_element_type=f32) + bq_ref[...]
    qb = q.astype(bf16)

    # Per-head scores / softmax / context.  Head contexts are concatenated into a single
    # lane-dense (TQ, H) bf16 operand (one unmasked relayout, no per-head masked stores).
    ctx_heads = []
    for h in range(num_heads):
        sl = slice(h * head_dim, (h + 1) * head_dim)
        # scores_h = q_h @ k_h^T as dot_general (no explicit transpose op).
        s = lax.dot_general(qb[:, sl], k_sc[:, sl],
                            dimension_numbers=(((1,), (1,)), ((), ())),
                            preferred_element_type=f32) + mask      # (TQ, L)
        s = s - jnp.max(s, axis=-1, keepdims=True)
        e = jnp.exp(s)
        p = e * pl.reciprocal(jnp.sum(e, axis=-1, keepdims=True), approx=True)
        if probs_ref is not None:
            probs_ref[0, h] = p.astype(probs_ref.dtype)             # (TQ, L) lane-dim-L store
        ctx_heads.append(jnp.dot(p.astype(bf16), v_sc[:, sl],
                                 preferred_element_type=f32))       # (TQ, dh) f32
    ctx = jnp.concatenate(ctx_heads, axis=-1).astype(bf16)          # (TQ, H) bf16, lane-dense

    # BertAudioSelfOutput: one dense (K = H) + residual + LayerNorm (dropout = identity).
    att_pre = jnp.dot(ctx, wo_ref[...], preferred_element_type=f32) + bo_ref[...]
    att = _layernorm(att_pre + x_q, g1_ref[...], be1_ref[...])

    # BertAudioIntermediate: dense + GELU.
    inter = _gelu_tanh(jnp.dot(att.astype(bf16), wi_ref[...],
                               preferred_element_type=f32) + bi_ref[...])

    # BertAudioOutput: dense + residual + LayerNorm (dropout = identity).
    y = jnp.dot(inter.astype(bf16), w2_ref[...],
                preferred_element_type=f32) + b2_ref[...]
    out_ref[0] = _layernorm(y + att, g2_ref[...], be2_ref[...]).astype(out_ref.dtype)


# --------------------------------- wrapper -----------------------------------

# Narrow fallback set for the single-buffered (pl.Buffered(1)) path: only API-signature /
# lowering failures degrade to default double-buffering; unrelated bugs still raise.
_BUFFERED_FALLBACK_ERRORS = tuple(
    e for e in (
        getattr(pltpu, "LoweringException", None),
        getattr(getattr(jax, "errors", None), "JaxRuntimeError", None),
        NotImplementedError,
        TypeError,
        ValueError,
    )
    if isinstance(e, type) and issubclass(e, BaseException))


def _supports_single_buffering():
    if not hasattr(pl, "Buffered"):
        return False
    try:
        return "pipeline_mode" in inspect.signature(pl.BlockSpec).parameters
    except (TypeError, ValueError):
        return False


def bert_audio_layer(hidden_states, attention_mask, params, num_heads,
                     return_probs=True, q_tile=None,
                     vmem_limit_bytes=56 * 1024 * 1024):
    """Fused BertAudioLayer forward.

    Tuning notes:
      * q_tile defaults to min(L, 128) (matches v5e's 128-wide MXU and v7x's 64 MiB VMEM).
        On v6e (2x256 MXU, 128 MiB VMEM) use q_tile=256 and vmem_limit_bytes ~96 MiB.
      * The batch grid axis is "parallel"; the query-tile axis must stay "arbitrary"
        because the per-batch K/V cache is carried in scratch across it.
    """
    B, T, S, H = hidden_states.shape
    L = T * S
    assert H % num_heads == 0
    head_dim = H // num_heads
    I = params["wi"].shape[1]
    scale = 1.0 / math.sqrt(head_dim)

    TQ = q_tile if q_tile is not None else min(L, 128)
    assert L % TQ == 0, "sequence length must be a multiple of the query tile"
    NQ = L // TQ

    f32, bf16 = jnp.float32, jnp.bfloat16

    # Full x in bf16: halves HBM DMA + VMEM residency of the largest block; only the (TQ, H)
    # query tile is upcast to f32 in-kernel for the residual / LayerNorm path.
    x = hidden_states.reshape(B, L, H).astype(bf16)
    mask = attention_mask.reshape(B, 1, L).astype(f32)

    # Weights in bf16; 1/sqrt(head_dim) folded into Wq AND bq (static transform, not a
    # per-tile input pre-scale).  Biases / LN params stay f32.
    wq = (params["wq"] * scale).astype(bf16)
    bq = (params["bq"] * scale).astype(f32)
    wk = params["wk"].astype(bf16)
    wv = params["wv"].astype(bf16)
    wo = params["wo"].astype(bf16)
    wi = params["wi"].astype(bf16)
    w2 = params["w2"].astype(bf16)
    fp = lambda n: params[n].astype(f32)

    kernel = functools.partial(_bert_audio_layer_kernel,
                               num_heads, head_dim, TQ, return_probs)

    def build_call(single_buffer):
        def const_spec(shape):
            nd = len(shape)
            imap = lambda b, qt, _n=nd: (0,) * _n
            if single_buffer:
                # Weights never change across grid steps: single-buffer them.
                return pl.BlockSpec(shape, imap, pipeline_mode=pl.Buffered(1))
            return pl.BlockSpec(shape, imap)

        def x_spec():
            imap = lambda b, qt: (b, 0, 0)
            if single_buffer:
                # Full-x only changes at batch boundaries: no need to double-buffer it.
                return pl.BlockSpec((1, L, H), imap, pipeline_mode=pl.Buffered(1))
            return pl.BlockSpec((1, L, H), imap)

        in_specs = [
            x_spec(),                                             # full x (K/V + query rows)
            pl.BlockSpec((1, 1, L), lambda b, qt: (b, 0, 0)),     # additive mask
            const_spec((H, H)), const_spec((1, H)),               # Wq (pre-scaled), bq
            const_spec((H, H)), const_spec((1, H)),               # Wk, bk
            const_spec((H, H)), const_spec((1, H)),               # Wv, bv
            const_spec((H, H)), const_spec((1, H)),               # Wo, bo
            const_spec((1, H)), const_spec((1, H)),               # LN1 gamma, beta
            const_spec((H, I)), const_spec((1, I)),               # Wi, bi
            const_spec((I, H)), const_spec((1, H)),               # W2, b2
            const_spec((1, H)), const_spec((1, H)),               # LN2 gamma, beta
        ]
        out_specs = [pl.BlockSpec((1, TQ, H), lambda b, qt: (b, qt, 0))]
        out_shape = [jax.ShapeDtypeStruct((B, L, H), f32)]
        if return_probs:
            out_specs.append(
                pl.BlockSpec((1, num_heads, TQ, L), lambda b, qt: (b, 0, qt, 0)))
            out_shape.append(
                jax.ShapeDtypeStruct((B, num_heads, L, L), bf16))   # bf16 probs writeback

        return pl.pallas_call(
            kernel,
            out_shape=out_shape,
            grid_spec=pltpu.PrefetchScalarGridSpec(
                num_scalar_prefetch=0,
                grid=(B, NQ),
                in_specs=in_specs,
                out_specs=out_specs,
                scratch_shapes=[pltpu.VMEM((L, H), bf16),           # K cache (per batch)
                                pltpu.VMEM((L, H), bf16)],          # V cache (per batch)
            ),
            compiler_params=pltpu.CompilerParams(
                # K/V scratch is carried across the query-tile axis -> "arbitrary";
                # batch stays "parallel" so both v7x TensorCores are used when B >= 2.
                dimension_semantics=("parallel", "arbitrary"),
                vmem_limit_bytes=vmem_limit_bytes,
            ),
        )

    args = (x, mask,
            wq, bq, wk, fp("bk"), wv, fp("bv"),
            wo, fp("bo"), fp("g1"), fp("be1"),
            wi, fp("bi"), w2, fp("b2"), fp("g2"), fp("be2"))

    if _supports_single_buffering():
        try:
            result = build_call(single_buffer=True)(*args)
        except _BUFFERED_FALLBACK_ERRORS:
            result = build_call(single_buffer=False)(*args)
    else:
        result = build_call(single_buffer=False)(*args)

    if return_probs:
        out, probs = result
        return out.reshape(B, T, S, H), probs
    (out,) = result
    return out.reshape(B, T, S, H), None


# ------------------------------ pure-JAX reference ----------------------------

def _reference(hidden_states, attention_mask, params, num_heads):
    from jax.scipy.special import erf as _erf
    hi = lax.Precision.HIGHEST
    B, T, S, H = hidden_states.shape
    L = T * S
    dh = H // num_heads
    x = hidden_states.reshape(B, L, H)
    mask = attention_mask.reshape(B, 1, 1, L)

    def lin(z, w, b):
        return jnp.einsum("blh,hk->blk", z, w, precision=hi) + b

    def ln(z, g, be, eps=1e-12):
        u = jnp.mean(z, -1, keepdims=True)
        s = jnp.mean((z - u) ** 2, -1, keepdims=True)
        return g * ((z - u) / jnp.sqrt(s + eps)) + be

    q = lin(x, params["wq"], params["bq"]).reshape(B, L, num_heads, dh).transpose(0, 2, 1, 3)
    k = lin(x, params["wk"], params["bk"]).reshape(B, L, num_heads, dh).transpose(0, 2, 1, 3)
    v = lin(x, params["wv"], params["bv"]).reshape(B, L, num_heads, dh).transpose(0, 2, 1, 3)
    scores = jnp.einsum("bhqd,bhkd->bhqk", q, k, precision=hi) / math.sqrt(dh) + mask
    probs = jax.nn.softmax(scores, axis=-1)
    ctx = jnp.einsum("bhqk,bhkd->bhqd", probs, v, precision=hi)
    ctx = ctx.transpose(0, 2, 1, 3).reshape(B, L, H)
    att = ln(lin(ctx, params["wo"], params["bo"]) + x, params["g1"], params["be1"])
    pre = lin(att, params["wi"], params["bi"])
    inter = pre * 0.5 * (1.0 + _erf(pre / math.sqrt(2.0)))
    out = ln(lin(inter, params["w2"], params["b2"]) + att, params["g2"], params["be2"])
    return out.reshape(B, T, S, H), probs


# ----------------------------------- main -------------------------------------

if __name__ == "__main__":
    B, T, S = 2, 2, 4
    H, num_heads, I = 32, 4, 64          # a_hidden_size, v_num_attention_heads, a_intermediate_size
    L = T * S

    key = jax.random.PRNGKey(0)
    keys = jax.random.split(key, 20)

    def w(k, shape):
        return jax.random.normal(k, shape, jnp.float32) * 0.02

    params = dict(
        wq=w(keys[0], (H, H)), bq=w(keys[1], (1, H)),
        wk=w(keys[2], (H, H)), bk=w(keys[3], (1, H)),
        wv=w(keys[4], (H, H)), bv=w(keys[5], (1, H)),
        wo=w(keys[6], (H, H)), bo=w(keys[7], (1, H)),
        g1=1.0 + w(keys[8], (1, H)), be1=w(keys[9], (1, H)),
        wi=w(keys[10], (H, I)), bi=w(keys[11], (1, I)),
        w2=w(keys[12], (I, H)), b2=w(keys[13], (1, H)),
        g2=1.0 + w(keys[14], (1, H)), be2=w(keys[15], (1, H)),
    )

    hidden_states = jax.random.normal(keys[16], (B, T, S, H), jnp.float32)
    # Additive BERT-style mask: 0 where attended, -10000 where masked out.
    keep = (jax.random.uniform(keys[17], (B, L)) > 0.2).astype(jnp.float32)
    keep = keep.at[:, 0].set(1.0)   # keep at least one position per batch
    attention_mask = (1.0 - keep) * -10000.0

    out, probs = bert_audio_layer(hidden_states, attention_mask, params, num_heads,
                                  return_probs=True)
    jax.block_until_ready((out, probs))

    ref_out, ref_probs = _reference(hidden_states, attention_mask, params, num_heads)
    assert out.shape == (B, T, S, H)
    assert probs.shape == (B, num_heads, L, L)
    # Tolerances account for bf16 inputs/weights/probs + approx reciprocal / tanh-GELU.
    np.testing.assert_allclose(np.asarray(out), np.asarray(ref_out), rtol=1e-2, atol=1e-2)
    np.testing.assert_allclose(np.asarray(probs).astype(np.float32), np.asarray(ref_probs),
                               rtol=1e-2, atol=1e-2)

    # Exercise the probs-free fast path (no O(L^2) writeback) as well.
    out2, probs2 = bert_audio_layer(hidden_states, attention_mask, params, num_heads,
                                    return_probs=False)
    jax.block_until_ready(out2)
    assert probs2 is None
    np.testing.assert_allclose(np.asarray(out2), np.asarray(ref_out), rtol=1e-2, atol=1e-2)

    print("KERNEL_OK")
</pallas_src>

<mosaic_0001>
module attributes {stable_mosaic.version = 11 : i64} {
  func.func @_bert_audio_layer_kernel(%arg0: i32, %arg1: i32, %arg2: memref<1x8x32xbf16, #tpu.memory_space<vmem>>, %arg3: memref<1x1x8xf32, #tpu.memory_space<vmem>>, %arg4: memref<32x32xbf16, #tpu.memory_space<vmem>>, %arg5: memref<1x32xf32, #tpu.memory_space<vmem>>, %arg6: memref<32x32xbf16, #tpu.memory_space<vmem>>, %arg7: memref<1x32xf32, #tpu.memory_space<vmem>>, %arg8: memref<32x32xbf16, #tpu.memory_space<vmem>>, %arg9: memref<1x32xf32, #tpu.memory_space<vmem>>, %arg10: memref<32x32xbf16, #tpu.memory_space<vmem>>, %arg11: memref<1x32xf32, #tpu.memory_space<vmem>>, %arg12: memref<1x32xf32, #tpu.memory_space<vmem>>, %arg13: memref<1x32xf32, #tpu.memory_space<vmem>>, %arg14: memref<32x64xbf16, #tpu.memory_space<vmem>>, %arg15: memref<1x64xf32, #tpu.memory_space<vmem>>, %arg16: memref<64x32xbf16, #tpu.memory_space<vmem>>, %arg17: memref<1x32xf32, #tpu.memory_space<vmem>>, %arg18: memref<1x32xf32, #tpu.memory_space<vmem>>, %arg19: memref<1x32xf32, #tpu.memory_space<vmem>>, %arg20: memref<1x8x32xf32, #tpu.memory_space<vmem>>, %arg21: memref<1x4x8x8xbf16, #tpu.memory_space<vmem>>, %arg22: memref<8x32xbf16, #tpu.memory_space<vmem>>, %arg23: memref<8x32xbf16, #tpu.memory_space<vmem>>) attributes {dimension_semantics = [#tpu.dimension_semantics<parallel>, #tpu.dimension_semantics<arbitrary>], iteration_bounds = array<i64: 2, 1>, scalar_prefetch = 0 : i64, scratch_operands = 2 : i64, tpu.core_type = #tpu.core_type<tc>, window_params = [{pipeline_mode = #tpu.pipeline_mode<synchronous>, transform_indices = @transform_0, window_bounds = array<i64: 1, 8, 32>}, {transform_indices = @transform_1, window_bounds = array<i64: 1, 1, 8>}, {pipeline_mode = #tpu.pipeline_mode<synchronous>, transform_indices = @transform_2, window_bounds = array<i64: 32, 32>}, {pipeline_mode = #tpu.pipeline_mode<synchronous>, transform_indices = @transform_3, window_bounds = array<i64: 1, 32>}, {pipeline_mode = #tpu.pipeline_mode<synchronous>, transform_indices = @transform_4, window_bounds = array<i64: 32, 32>}, {pipeline_mode = #tpu.pipeline_mode<synchronous>, transform_indices = @transform_5, window_bounds = array<i64: 1, 32>}, {pipeline_mode = #tpu.pipeline_mode<synchronous>, transform_indices = @transform_6, window_bounds = array<i64: 32, 32>}, {pipeline_mode = #tpu.pipeline_mode<synchronous>, transform_indices = @transform_7, window_bounds = array<i64: 1, 32>}, {pipeline_mode = #tpu.pipeline_mode<synchronous>, transform_indices = @transform_8, window_bounds = array<i64: 32, 32>}, {pipeline_mode = #tpu.pipeline_mode<synchronous>, transform_indices = @transform_9, window_bounds = array<i64: 1, 32>}, {pipeline_mode = #tpu.pipeline_mode<synchronous>, transform_indices = @transform_10, window_bounds = array<i64: 1, 32>}, {pipeline_mode = #tpu.pipeline_mode<synchronous>, transform_indices = @transform_11, window_bounds = array<i64: 1, 32>}, {pipeline_mode = #tpu.pipeline_mode<synchronous>, transform_indices = @transform_12, window_bounds = array<i64: 32, 64>}, {pipeline_mode = #tpu.pipeline_mode<synchronous>, transform_indices = @transform_13, window_bounds = array<i64: 1, 64>}, {pipeline_mode = #tpu.pipeline_mode<synchronous>, transform_indices = @transform_14, window_bounds = array<i64: 64, 32>}, {pipeline_mode = #tpu.pipeline_mode<synchronous>, transform_indices = @transform_15, window_bounds = array<i64: 1, 32>}, {pipeline_mode = #tpu.pipeline_mode<synchronous>, transform_indices = @transform_16, window_bounds = array<i64: 1, 32>}, {pipeline_mode = #tpu.pipeline_mode<synchronous>, transform_indices = @transform_17, window_bounds = array<i64: 1, 32>}, {transform_indices = @transform_18, window_bounds = array<i64: 1, 8, 32>}, {transform_indices = @transform_19, window_bounds = array<i64: 1, 4, 8, 8>}]} {
    %c0_i32 = arith.constant 0 : i32
    %0 = arith.cmpi eq, %arg1, %c0_i32 : i32
    %1 = arith.extui %0 : i1 to i32
    %c0_i32_0 = arith.constant 0 : i32
    %2 = arith.cmpi ne, %1, %c0_i32_0 : i32
    scf.if %2 {
      %c0_91 = arith.constant 0 : index
      %c0_92 = arith.constant 0 : index
      %c0_93 = arith.constant 0 : index
      %186 = vector.load %arg2[%c0_91, %c0_92, %c0_93] : memref<1x8x32xbf16, #tpu.memory_space<vmem>>, vector<1x8x32xbf16>
      %187 = vector.shape_cast %186 : vector<1x8x32xbf16> to vector<8x32xbf16>
      %c0_94 = arith.constant 0 : index
      %c0_95 = arith.constant 0 : index
      %188 = vector.load %arg6[%c0_94, %c0_95] : memref<32x32xbf16, #tpu.memory_space<vmem>>, vector<32x32xbf16>
      %cst_96 = arith.constant dense<0.000000e+00> : vector<8x32xf32>
      %189 = tpu.matmul %187, %188, %cst_96 {dimension_numbers = #tpu.dot_dimension_numbers<[1], [0], [0], [1], [0, 0, 1, 1], [], []>} : vector<8x32xbf16>, vector<32x32xbf16>, vector<8x32xf32> -> vector<8x32xf32>
      %c0_97 = arith.constant 0 : index
      %c0_98 = arith.constant 0 : index
      %190 = vector.load %arg7[%c0_97, %c0_98] : memref<1x32xf32, #tpu.memory_space<vmem>>, vector<1x32xf32>
      %191 = vector.broadcast %190 : vector<1x32xf32> to vector<8x32xf32>
      %192 = arith.addf %189, %191 : vector<8x32xf32>
      %c0_99 = arith.constant 0 : index
      %c0_100 = arith.constant 0 : index
      %193 = vector.load %arg8[%c0_99, %c0_100] : memref<32x32xbf16, #tpu.memory_space<vmem>>, vector<32x32xbf16>
      %cst_101 = arith.constant dense<0.000000e+00> : vector<8x32xf32>
      %194 = tpu.matmul %187, %193, %cst_101 {dimension_numbers = #tpu.dot_dimension_numbers<[1], [0], [0], [1], [0, 0, 1, 1], [], []>} : vector<8x32xbf16>, vector<32x32xbf16>, vector<8x32xf32> -> vector<8x32xf32>
      %c0_102 = arith.constant 0 : index
      %c0_103 = arith.constant 0 : index
      %195 = vector.load %arg9[%c0_102, %c0_103] : memref<1x32xf32, #tpu.memory_space<vmem>>, vector<1x32xf32>
      %196 = vector.broadcast %195 : vector<1x32xf32> to vector<8x32xf32>
      %197 = arith.addf %194, %196 : vector<8x32xf32>
      %198 = arith.truncf %192 : vector<8x32xf32> to vector<8x32xbf16>
      %c0_104 = arith.constant 0 : index
      %c0_105 = arith.constant 0 : index
      %199 = vector.load %arg22[%c0_104, %c0_105] : memref<8x32xbf16, #tpu.memory_space<vmem>>, vector<8x32xbf16>
      tpu.vector_store %arg22[%c0_104, %c0_105], %198 {strides = array<i32>} : memref<8x32xbf16, #tpu.memory_space<vmem>>, vector<8x32xbf16>,
      %200 = arith.truncf %197 : vector<8x32xf32> to vector<8x32xbf16>
      %c0_106 = arith.constant 0 : index
      %c0_107 = arith.constant 0 : index
      %201 = vector.load %arg23[%c0_106, %c0_107] : memref<8x32xbf16, #tpu.memory_space<vmem>>, vector<8x32xbf16>
      tpu.vector_store %arg23[%c0_106, %c0_107], %200 {strides = array<i32>} : memref<8x32xbf16, #tpu.memory_space<vmem>>, vector<8x32xbf16>,
    } else {
    }
    %c8_i32 = arith.constant 8 : i32
    %3 = arith.muli %arg1, %c8_i32 : i32
    %4 = tpu.assume_multiple %3, 8 : i32
    %c0 = arith.constant 0 : index
    %5 = arith.index_cast %4 : i32 to index
    %c0_1 = arith.constant 0 : index
    %6 = vector.load %arg2[%c0, %5, %c0_1] : memref<1x8x32xbf16, #tpu.memory_space<vmem>>, vector<1x8x32xbf16>
    %7 = vector.shape_cast %6 : vector<1x8x32xbf16> to vector<8x32xbf16>
    %8 = arith.extf %7 : vector<8x32xbf16> to vector<8x32xf32>
    %c0_2 = arith.constant 0 : index
    %c0_3 = arith.constant 0 : index
    %c0_4 = arith.constant 0 : index
    %9 = vector.load %arg3[%c0_2, %c0_3, %c0_4] : memref<1x1x8xf32, #tpu.memory_space<vmem>>, vector<1x1x8xf32>
    %10 = vector.shape_cast %9 : vector<1x1x8xf32> to vector<1x8xf32>
    %c0_5 = arith.constant 0 : index
    %c0_6 = arith.constant 0 : index
    %11 = vector.load %arg4[%c0_5, %c0_6] : memref<32x32xbf16, #tpu.memory_space<vmem>>, vector<32x32xbf16>
    %cst = arith.constant dense<0.000000e+00> : vector<8x32xf32>
    %12 = tpu.matmul %7, %11, %cst {dimension_numbers = #tpu.dot_dimension_numbers<[1], [0], [0], [1], [0, 0, 1, 1], [], []>} : vector<8x32xbf16>, vector<32x32xbf16>, vector<8x32xf32> -> vector<8x32xf32>
    %c0_7 = arith.constant 0 : index
    %c0_8 = arith.constant 0 : index
    %13 = vector.load %arg5[%c0_7, %c0_8] : memref<1x32xf32, #tpu.memory_space<vmem>>, vector<1x32xf32>
    %14 = vector.broadcast %13 : vector<1x32xf32> to vector<8x32xf32>
    %15 = arith.addf %12, %14 : vector<8x32xf32>
    %16 = arith.truncf %15 : vector<8x32xf32> to vector<8x32xbf16>
    %17 = vector.extract_strided_slice %16 {offsets = [0, 0], sizes = [8, 8], strides = [1, 1]} : vector<8x32xbf16> to vector<8x8xbf16>
    %c0_9 = arith.constant 0 : index
    %c0_10 = arith.constant 0 : index
    %18 = vector.load %arg22[%c0_9, %c0_10] : memref<8x32xbf16, #tpu.memory_space<vmem>>, vector<8x8xbf16>
    %cst_11 = arith.constant dense<0.000000e+00> : vector<8x8xf32>
    %19 = tpu.matmul %17, %18, %cst_11 {dimension_numbers = #tpu.dot_dimension_numbers<[1], [1], [0], [0], [0, 0, 1, 0], [], []>} : vector<8x8xbf16>, vector<8x8xbf16>, vector<8x8xf32> -> vector<8x8xf32>
    %20 = vector.broadcast %10 : vector<1x8xf32> to vector<8x8xf32>
    %21 = arith.addf %19, %20 : vector<8x8xf32>
    %cst_12 = arith.constant dense<0xFF800000> : vector<8xf32>
    %22 = vector.multi_reduction <maximumf>, %21, %cst_12 [1] : vector<8x8xf32> to vector<8xf32>
    %23 = vector.shape_cast %22 : vector<8xf32> to vector<8x1xf32>
    %24 = vector.broadcast %23 : vector<8x1xf32> to vector<8x8xf32>
    %25 = arith.subf %21, %24 : vector<8x8xf32>
    %26 = math.exp %25 : vector<8x8xf32>
    %cst_13 = arith.constant dense<0.000000e+00> : vector<8xf32>
    %27 = vector.multi_reduction <add>, %26, %cst_13 [1] : vector<8x8xf32> to vector<8xf32>
    %28 = vector.shape_cast %27 : vector<8xf32> to vector<8x1xf32>
    %29 = tpu.reciprocal %28 {approx = true} : vector<8x1xf32> -> vector<8x1xf32>
    %30 = vector.broadcast %29 : vector<8x1xf32> to vector<8x8xf32>
    %31 = arith.mulf %26, %30 : vector<8x8xf32>
    %32 = arith.truncf %31 : vector<8x8xf32> to vector<8x8xbf16>
    %c0_14 = arith.constant 0 : index
    %c0_15 = arith.constant 0 : index
    %c0_16 = arith.constant 0 : index
    %c0_17 = arith.constant 0 : index
    %33 = vector.load %arg21[%c0_14, %c0_15, %c0_16, %c0_17] : memref<1x4x8x8xbf16, #tpu.memory_space<vmem>>, vector<1x1x8x8xbf16>
    %34 = vector.shape_cast %33 : vector<1x1x8x8xbf16> to vector<8x8xbf16>
    %35 = vector.shape_cast %32 : vector<8x8xbf16> to vector<1x1x8x8xbf16>
    tpu.vector_store %arg21[%c0_14, %c0_15, %c0_16, %c0_17], %35 {strides = array<i32>} : memref<1x4x8x8xbf16, #tpu.memory_space<vmem>>, vector<1x1x8x8xbf16>,
    %36 = arith.truncf %31 : vector<8x8xf32> to vector<8x8xbf16>
    %c0_18 = arith.constant 0 : index
    %c0_19 = arith.constant 0 : index
    %37 = vector.load %arg23[%c0_18, %c0_19] : memref<8x32xbf16, #tpu.memory_space<vmem>>, vector<8x8xbf16>
    %cst_20 = arith.constant dense<0.000000e+00> : vector<8x8xf32>
    %38 = tpu.matmul %36, %37, %cst_20 {dimension_numbers = #tpu.dot_dimension_numbers<[1], [0], [0], [1], [0, 0, 1, 1], [], []>} : vector<8x8xbf16>, vector<8x8xbf16>, vector<8x8xf32> -> vector<8x8xf32>
    %39 = vector.extract_strided_slice %16 {offsets = [0, 8], sizes = [8, 8], strides = [1, 1]} : vector<8x32xbf16> to vector<8x8xbf16>
    %c0_21 = arith.constant 0 : index
    %c8 = arith.constant 8 : index
    %40 = vector.load %arg22[%c0_21, %c8] : memref<8x32xbf16, #tpu.memory_space<vmem>>, vector<8x8xbf16>
    %cst_22 = arith.constant dense<0.000000e+00> : vector<8x8xf32>
    %41 = tpu.matmul %39, %40, %cst_22 {dimension_numbers = #tpu.dot_dimension_numbers<[1], [1], [0], [0], [0, 0, 1, 0], [], []>} : vector<8x8xbf16>, vector<8x8xbf16>, vector<8x8xf32> -> vector<8x8xf32>
    %42 = vector.broadcast %10 : vector<1x8xf32> to vector<8x8xf32>
    %43 = arith.addf %41, %42 : vector<8x8xf32>
    %cst_23 = arith.constant dense<0xFF800000> : vector<8xf32>
    %44 = vector.multi_reduction <maximumf>, %43, %cst_23 [1] : vector<8x8xf32> to vector<8xf32>
    %45 = vector.shape_cast %44 : vector<8xf32> to vector<8x1xf32>
    %46 = vector.broadcast %45 : vector<8x1xf32> to vector<8x8xf32>
    %47 = arith.subf %43, %46 : vector<8x8xf32>
    %48 = math.exp %47 : vector<8x8xf32>
    %cst_24 = arith.constant dense<0.000000e+00> : vector<8xf32>
    %49 = vector.multi_reduction <add>, %48, %cst_24 [1] : vector<8x8xf32> to vector<8xf32>
    %50 = vector.shape_cast %49 : vector<8xf32> to vector<8x1xf32>
    %51 = tpu.reciprocal %50 {approx = true} : vector<8x1xf32> -> vector<8x1xf32>
    %52 = vector.broadcast %51 : vector<8x1xf32> to vector<8x8xf32>
    %53 = arith.mulf %48, %52 : vector<8x8xf32>
    %54 = arith.truncf %53 : vector<8x8xf32> to vector<8x8xbf16>
    %c0_25 = arith.constant 0 : index
    %c1 = arith.constant 1 : index
    %c0_26 = arith.constant 0 : index
    %c0_27 = arith.constant 0 : index
    %55 = vector.load %arg21[%c0_25, %c1, %c0_26, %c0_27] : memref<1x4x8x8xbf16, #tpu.memory_space<vmem>>, vector<1x1x8x8xbf16>
    %56 = vector.shape_cast %55 : vector<1x1x8x8xbf16> to vector<8x8xbf16>
    %57 = vector.shape_cast %54 : vector<8x8xbf16> to vector<1x1x8x8xbf16>
    tpu.vector_store %arg21[%c0_25, %c1, %c0_26, %c0_27], %57 {strides = array<i32>} : memref<1x4x8x8xbf16, #tpu.memory_space<vmem>>, vector<1x1x8x8xbf16>,
    %58 = arith.truncf %53 : vector<8x8xf32> to vector<8x8xbf16>
    %c0_28 = arith.constant 0 : index
    %c8_29 = arith.constant 8 : index
    %59 = vector.load %arg23[%c0_28, %c8_29] : memref<8x32xbf16, #tpu.memory_space<vmem>>, vector<8x8xbf16>
    %cst_30 = arith.constant dense<0.000000e+00> : vector<8x8xf32>
    %60 = tpu.matmul %58, %59, %cst_30 {dimension_numbers = #tpu.dot_dimension_numbers<[1], [0], [0], [1], [0, 0, 1, 1], [], []>} : vector<8x8xbf16>, vector<8x8xbf16>, vector<8x8xf32> -> vector<8x8xf32>
    %61 = vector.extract_strided_slice %16 {offsets = [0, 16], sizes = [8, 8], strides = [1, 1]} : vector<8x32xbf16> to vector<8x8xbf16>
    %c0_31 = arith.constant 0 : index
    %c16 = arith.constant 16 : index
    %62 = vector.load %arg22[%c0_31, %c16] : memref<8x32xbf16, #tpu.memory_space<vmem>>, vector<8x8xbf16>
    %cst_32 = arith.constant dense<0.000000e+00> : vector<8x8xf32>
    %63 = tpu.matmul %61, %62, %cst_32 {dimension_numbers = #tpu.dot_dimension_numbers<[1], [1], [0], [0], [0, 0, 1, 0], [], []>} : vector<8x8xbf16>, vector<8x8xbf16>, vector<8x8xf32> -> vector<8x8xf32>
    %64 = vector.broadcast %10 : vector<1x8xf32> to vector<8x8xf32>
    %65 = arith.addf %63, %64 : vector<8x8xf32>
    %cst_33 = arith.constant dense<0xFF800000> : vector<8xf32>
    %66 = vector.multi_reduction <maximumf>, %65, %cst_33 [1] : vector<8x8xf32> to vector<8xf32>
    %67 = vector.shape_cast %66 : vector<8xf32> to vector<8x1xf32>
    %68 = vector.broadcast %67 : vector<8x1xf32> to vector<8x8xf32>
    %69 = arith.subf %65, %68 : vector<8x8xf32>
    %70 = math.exp %69 : vector<8x8xf32>
    %cst_34 = arith.constant dense<0.000000e+00> : vector<8xf32>
    %71 = vector.multi_reduction <add>, %70, %cst_34 [1] : vector<8x8xf32> to vector<8xf32>
    %72 = vector.shape_cast %71 : vector<8xf32> to vector<8x1xf32>
    %73 = tpu.reciprocal %72 {approx = true} : vector<8x1xf32> -> vector<8x1xf32>
    %74 = vector.broadcast %73 : vector<8x1xf32> to vector<8x8xf32>
    %75 = arith.mulf %70, %74 : vector<8x8xf32>
    %76 = arith.truncf %75 : vector<8x8xf32> to vector<8x8xbf16>
    %c0_35 = arith.constant 0 : index
    %c2 = arith.constant 2 : index
    %c0_36 = arith.constant 0 : index
    %c0_37 = arith.constant 0 : index
    %77 = vector.load %arg21[%c0_35, %c2, %c0_36, %c0_37] : memref<1x4x8x8xbf16, #tpu.memory_space<vmem>>, vector<1x1x8x8xbf16>
    %78 = vector.shape_cast %77 : vector<1x1x8x8xbf16> to vector<8x8xbf16>
    %79 = vector.shape_cast %76 : vector<8x8xbf16> to vector<1x1x8x8xbf16>
    tpu.vector_store %arg21[%c0_35, %c2, %c0_36, %c0_37], %79 {strides = array<i32>} : memref<1x4x8x8xbf16, #tpu.memory_space<vmem>>, vector<1x1x8x8xbf16>,
    %80 = arith.truncf %75 : vector<8x8xf32> to vector<8x8xbf16>
    %c0_38 = arith.constant 0 : index
    %c16_39 = arith.constant 16 : index
    %81 = vector.load %arg23[%c0_38, %c16_39] : memref<8x32xbf16, #tpu.memory_space<vmem>>, vector<8x8xbf16>
    %cst_40 = arith.constant dense<0.000000e+00> : vector<8x8xf32>
    %82 = tpu.matmul %80, %81, %cst_40 {dimension_numbers = #tpu.dot_dimension_numbers<[1], [0], [0], [1], [0, 0, 1, 1], [], []>} : vector<8x8xbf16>, vector<8x8xbf16>, vector<8x8xf32> -> vector<8x8xf32>
    %83 = vector.extract_strided_slice %16 {offsets = [0, 24], sizes = [8, 8], strides = [1, 1]} : vector<8x32xbf16> to vector<8x8xbf16>
    %c0_41 = arith.constant 0 : index
    %c24 = arith.constant 24 : index
    %84 = vector.load %arg22[%c0_41, %c24] : memref<8x32xbf16, #tpu.memory_space<vmem>>, vector<8x8xbf16>
    %cst_42 = arith.constant dense<0.000000e+00> : vector<8x8xf32>
    %85 = tpu.matmul %83, %84, %cst_42 {dimension_numbers = #tpu.dot_dimension_numbers<[1], [1], [0], [0], [0, 0, 1, 0], [], []>} : vector<8x8xbf16>, vector<8x8xbf16>, vector<8x8xf32> -> vector<8x8xf32>
    %86 = vector.broadcast %10 : vector<1x8xf32> to vector<8x8xf32>
    %87 = arith.addf %85, %86 : vector<8x8xf32>
    %cst_43 = arith.constant dense<0xFF800000> : vector<8xf32>
    %88 = vector.multi_reduction <maximumf>, %87, %cst_43 [1] : vector<8x8xf32> to vector<8xf32>
    %89 = vector.shape_cast %88 : vector<8xf32> to vector<8x1xf32>
    %90 = vector.broadcast %89 : vector<8x1xf32> to vector<8x8xf32>
    %91 = arith.subf %87, %90 : vector<8x8xf32>
    %92 = math.exp %91 : vector<8x8xf32>
    %cst_44 = arith.constant dense<0.000000e+00> : vector<8xf32>
    %93 = vector.multi_reduction <add>, %92, %cst_44 [1] : vector<8x8xf32> to vector<8xf32>
    %94 = vector.shape_cast %93 : vector<8xf32> to vector<8x1xf32>
    %95 = tpu.reciprocal %94 {approx = true} : vector<8x1xf32> -> vector<8x1xf32>
    %96 = vector.broadcast %95 : vector<8x1xf32> to vector<8x8xf32>
    %97 = arith.mulf %92, %96 : vector<8x8xf32>
    %98 = arith.truncf %97 : vector<8x8xf32> to vector<8x8xbf16>
    %c0_45 = arith.constant 0 : index
    %c3 = arith.constant 3 : index
    %c0_46 = arith.constant 0 : index
    %c0_47 = arith.constant 0 : index
    %99 = vector.load %arg21[%c0_45, %c3, %c0_46, %c0_47] : memref<1x4x8x8xbf16, #tpu.memory_space<vmem>>, vector<1x1x8x8xbf16>
    %100 = vector.shape_cast %99 : vector<1x1x8x8xbf16> to vector<8x8xbf16>
    %101 = vector.shape_cast %98 : vector<8x8xbf16> to vector<1x1x8x8xbf16>
    tpu.vector_store %arg21[%c0_45, %c3, %c0_46, %c0_47], %101 {strides = array<i32>} : memref<1x4x8x8xbf16, #tpu.memory_space<vmem>>, vector<1x1x8x8xbf16>,
    %102 = arith.truncf %97 : vector<8x8xf32> to vector<8x8xbf16>
    %c0_48 = arith.constant 0 : index
    %c24_49 = arith.constant 24 : index
    %103 = vector.load %arg23[%c0_48, %c24_49] : memref<8x32xbf16, #tpu.memory_space<vmem>>, vector<8x8xbf16>
    %cst_50 = arith.constant dense<0.000000e+00> : vector<8x8xf32>
    %104 = tpu.matmul %102, %103, %cst_50 {dimension_numbers = #tpu.dot_dimension_numbers<[1], [0], [0], [1], [0, 0, 1, 1], [], []>} : vector<8x8xbf16>, vector<8x8xbf16>, vector<8x8xf32> -> vector<8x8xf32>
    %105 = tpu.concatenate %38, %60, %82, %104 in 1 : vector<8x8xf32>, vector<8x8xf32>, vector<8x8xf32>, vector<8x8xf32> -> vector<8x32xf32>
    %106 = arith.truncf %105 : vector<8x32xf32> to vector<8x32xbf16>
    %c0_51 = arith.constant 0 : index
    %c0_52 = arith.constant 0 : index
    %107 = vector.load %arg10[%c0_51, %c0_52] : memref<32x32xbf16, #tpu.memory_space<vmem>>, vector<32x32xbf16>
    %cst_53 = arith.constant dense<0.000000e+00> : vector<8x32xf32>
    %108 = tpu.matmul %106, %107, %cst_53 {dimension_numbers = #tpu.dot_dimension_numbers<[1], [0], [0], [1], [0, 0, 1, 1], [], []>} : vector<8x32xbf16>, vector<32x32xbf16>, vector<8x32xf32> -> vector<8x32xf32>
    %c0_54 = arith.constant 0 : index
    %c0_55 = arith.constant 0 : index
    %109 = vector.load %arg11[%c0_54, %c0_55] : memref<1x32xf32, #tpu.memory_space<vmem>>, vector<1x32xf32>
    %110 = vector.broadcast %109 : vector<1x32xf32> to vector<8x32xf32>
    %111 = arith.addf %108, %110 : vector<8x32xf32>
    %112 = arith.addf %111, %8 : vector<8x32xf32>
    %c0_56 = arith.constant 0 : index
    %c0_57 = arith.constant 0 : index
    %113 = vector.load %arg12[%c0_56, %c0_57] : memref<1x32xf32, #tpu.memory_space<vmem>>, vector<1x32xf32>
    %c0_58 = arith.constant 0 : index
    %c0_59 = arith.constant 0 : index
    %114 = vector.load %arg13[%c0_58, %c0_59] : memref<1x32xf32, #tpu.memory_space<vmem>>, vector<1x32xf32>
    %cst_60 = arith.constant dense<0.000000e+00> : vector<8xf32>
    %115 = vector.multi_reduction <add>, %112, %cst_60 [1] : vector<8x32xf32> to vector<8xf32>
    %116 = vector.shape_cast %115 : vector<8xf32> to vector<8x1xf32>
    %cst_61 = arith.constant 3.200000e+01 : f32
    %117 = vector.broadcast %cst_61 : f32 to vector<8x1xf32>
    %118 = arith.divf %116, %117 : vector<8x1xf32>
    %119 = vector.broadcast %118 : vector<8x1xf32> to vector<8x32xf32>
    %120 = arith.subf %112, %119 : vector<8x32xf32>
    %121 = arith.mulf %120, %120 : vector<8x32xf32>
    %cst_62 = arith.constant dense<0.000000e+00> : vector<8xf32>
    %122 = vector.multi_reduction <add>, %121, %cst_62 [1] : vector<8x32xf32> to vector<8xf32>
    %123 = vector.shape_cast %122 : vector<8xf32> to vector<8x1xf32>
    %cst_63 = arith.constant 3.200000e+01 : f32
    %124 = vector.broadcast %cst_63 : f32 to vector<8x1xf32>
    %125 = arith.divf %123, %124 : vector<8x1xf32>
    %cst_64 = arith.constant 9.99999996E-13 : f32
    %126 = vector.broadcast %cst_64 : f32 to vector<8x1xf32>
    %127 = arith.addf %125, %126 : vector<8x1xf32>
    %128 = math.rsqrt %127 : vector<8x1xf32>
    %129 = vector.broadcast %128 : vector<8x1xf32> to vector<8x32xf32>
    %130 = arith.mulf %120, %129 : vector<8x32xf32>
    %131 = vector.broadcast %113 : vector<1x32xf32> to vector<8x32xf32>
    %132 = arith.mulf %131, %130 : vector<8x32xf32>
    %133 = vector.broadcast %114 : vector<1x32xf32> to vector<8x32xf32>
    %134 = arith.addf %132, %133 : vector<8x32xf32>
    %135 = arith.truncf %134 : vector<8x32xf32> to vector<8x32xbf16>
    %c0_65 = arith.constant 0 : index
    %c0_66 = arith.constant 0 : index
    %136 = vector.load %arg14[%c0_65, %c0_66] : memref<32x64xbf16, #tpu.memory_space<vmem>>, vector<32x64xbf16>
    %cst_67 = arith.constant dense<0.000000e+00> : vector<8x64xf32>
    %137 = tpu.matmul %135, %136, %cst_67 {dimension_numbers = #tpu.dot_dimension_numbers<[1], [0], [0], [1], [0, 0, 1, 1], [], []>} : vector<8x32xbf16>, vector<32x64xbf16>, vector<8x64xf32> -> vector<8x64xf32>
    %c0_68 = arith.constant 0 : index
    %c0_69 = arith.constant 0 : index
    %138 = vector.load %arg15[%c0_68, %c0_69] : memref<1x64xf32, #tpu.memory_space<vmem>>, vector<1x64xf32>
    %139 = vector.broadcast %138 : vector<1x64xf32> to vector<8x64xf32>
    %140 = arith.addf %137, %139 : vector<8x64xf32>
    %cst_70 = arith.constant 5.000000e-01 : f32
    %141 = vector.broadcast %cst_70 : f32 to vector<8x64xf32>
    %142 = arith.mulf %141, %140 : vector<8x64xf32>
    %143 = arith.mulf %140, %140 : vector<8x64xf32>
    %144 = arith.mulf %143, %140 : vector<8x64xf32>
    %cst_71 = arith.constant 4.471500e-02 : f32
    %145 = vector.broadcast %cst_71 : f32 to vector<8x64xf32>
    %146 = arith.mulf %145, %144 : vector<8x64xf32>
    %147 = arith.addf %140, %146 : vector<8x64xf32>
    %cst_72 = arith.constant 0.797884583 : f32
    %148 = vector.broadcast %cst_72 : f32 to vector<8x64xf32>
    %149 = arith.mulf %148, %147 : vector<8x64xf32>
    %150 = math.tanh %149 : vector<8x64xf32>
    %cst_73 = arith.constant 1.000000e+00 : f32
    %151 = vector.broadcast %cst_73 : f32 to vector<8x64xf32>
    %152 = arith.addf %151, %150 : vector<8x64xf32>
    %153 = arith.mulf %142, %152 : vector<8x64xf32>
    %154 = arith.truncf %153 : vector<8x64xf32> to vector<8x64xbf16>
    %c0_74 = arith.constant 0 : index
    %c0_75 = arith.constant 0 : index
    %155 = vector.load %arg16[%c0_74, %c0_75] : memref<64x32xbf16, #tpu.memory_space<vmem>>, vector<64x32xbf16>
    %cst_76 = arith.constant dense<0.000000e+00> : vector<8x32xf32>
    %156 = tpu.matmul %154, %155, %cst_76 {dimension_numbers = #tpu.dot_dimension_numbers<[1], [0], [0], [1], [0, 0, 1, 1], [], []>} : vector<8x64xbf16>, vector<64x32xbf16>, vector<8x32xf32> -> vector<8x32xf32>
    %c0_77 = arith.constant 0 : index
    %c0_78 = arith.constant 0 : index
    %157 = vector.load %arg17[%c0_77, %c0_78] : memref<1x32xf32, #tpu.memory_space<vmem>>, vector<1x32xf32>
    %158 = vector.broadcast %157 : vector<1x32xf32> to vector<8x32xf32>
    %159 = arith.addf %156, %158 : vector<8x32xf32>
    %160 = arith.addf %159, %134 : vector<8x32xf32>
    %c0_79 = arith.constant 0 : index
    %c0_80 = arith.constant 0 : index
    %161 = vector.load %arg18[%c0_79, %c0_80] : memref<1x32xf32, #tpu.memory_space<vmem>>, vector<1x32xf32>
    %c0_81 = arith.constant 0 : index
    %c0_82 = arith.constant 0 : index
    %162 = vector.load %arg19[%c0_81, %c0_82] : memref<1x32xf32, #tpu.memory_space<vmem>>, vector<1x32xf32>
    %cst_83 = arith.constant dense<0.000000e+00> : vector<8xf32>
    %163 = vector.multi_reduction <add>, %160, %cst_83 [1] : vector<8x32xf32> to vector<8xf32>
    %164 = vector.shape_cast %163 : vector<8xf32> to vector<8x1xf32>
    %cst_84 = arith.constant 3.200000e+01 : f32
    %165 = vector.broadcast %cst_84 : f32 to vector<8x1xf32>
    %166 = arith.divf %164, %165 : vector<8x1xf32>
    %167 = vector.broadcast %166 : vector<8x1xf32> to vector<8x32xf32>
    %168 = arith.subf %160, %167 : vector<8x32xf32>
    %169 = arith.mulf %168, %168 : vector<8x32xf32>
    %cst_85 = arith.constant dense<0.000000e+00> : vector<8xf32>
    %170 = vector.multi_reduction <add>, %169, %cst_85 [1] : vector<8x32xf32> to vector<8xf32>
    %171 = vector.shape_cast %170 : vector<8xf32> to vector<8x1xf32>
    %cst_86 = arith.constant 3.200000e+01 : f32
    %172 = vector.broadcast %cst_86 : f32 to vector<8x1xf32>
    %173 = arith.divf %171, %172 : vector<8x1xf32>
    %cst_87 = arith.constant 9.99999996E-13 : f32
    %174 = vector.broadcast %cst_87 : f32 to vector<8x1xf32>
    %175 = arith.addf %173, %174 : vector<8x1xf32>
    %176 = math.rsqrt %175 : vector<8x1xf32>
    %177 = vector.broadcast %176 : vector<8x1xf32> to vector<8x32xf32>
    %178 = arith.mulf %168, %177 : vector<8x32xf32>
    %179 = vector.broadcast %161 : vector<1x32xf32> to vector<8x32xf32>
    %180 = arith.mulf %179, %178 : vector<8x32xf32>
    %181 = vector.broadcast %162 : vector<1x32xf32> to vector<8x32xf32>
    %182 = arith.addf %180, %181 : vector<8x32xf32>
    %c0_88 = arith.constant 0 : index
    %c0_89 = arith.constant 0 : index
    %c0_90 = arith.constant 0 : index
    %183 = vector.load %arg20[%c0_88, %c0_89, %c0_90] : memref<1x8x32xf32, #tpu.memory_space<vmem>>, vector<1x8x32xf32>
    %184 = vector.shape_cast %183 : vector<1x8x32xf32> to vector<8x32xf32>
    %185 = vector.shape_cast %182 : vector<8x32xf32> to vector<1x8x32xf32>
    tpu.vector_store %arg20[%c0_88, %c0_89, %c0_90], %185 {strides = array<i32>} : memref<1x8x32xf32, #tpu.memory_space<vmem>>, vector<1x8x32xf32>,
    return
  }
  func.func @transform_0(%arg0: i32, %arg1: i32) -> (i32, i32, i32) {
    %c0_i32 = arith.constant 0 : i32
    %c0_i32_0 = arith.constant 0 : i32
    %c0_i32_1 = arith.constant 0 : i32
    return %arg0, %c0_i32, %c0_i32_0 : i32, i32, i32
  }
  func.func @transform_1(%arg0: i32, %arg1: i32) -> (i32, i32, i32) {
    %c0_i32 = arith.constant 0 : i32
    %c0_i32_0 = arith.constant 0 : i32
    %c0_i32_1 = arith.constant 0 : i32
    return %arg0, %c0_i32, %c0_i32_0 : i32, i32, i32
  }
  func.func @transform_2(%arg0: i32, %arg1: i32) -> (i32, i32) {
    %c0_i32 = arith.constant 0 : i32
    %c0_i32_0 = arith.constant 0 : i32
    %c0_i32_1 = arith.constant 0 : i32
    return %c0_i32, %c0_i32_0 : i32, i32
  }
  func.func @transform_3(%arg0: i32, %arg1: i32) -> (i32, i32) {
    %c0_i32 = arith.constant 0 : i32
    %c0_i32_0 = arith.constant 0 : i32
    %c0_i32_1 = arith.constant 0 : i32
    return %c0_i32, %c0_i32_0 : i32, i32
  }
  func.func @transform_4(%arg0: i32, %arg1: i32) -> (i32, i32) {
    %c0_i32 = arith.constant 0 : i32
    %c0_i32_0 = arith.constant 0 : i32
    %c0_i32_1 = arith.constant 0 : i32
    return %c0_i32, %c0_i32_0 : i32, i32
  }
  func.func @transform_5(%arg0: i32, %arg1: i32) -> (i32, i32) {
    %c0_i32 = arith.constant 0 : i32
    %c0_i32_0 = arith.constant 0 : i32
    %c0_i32_1 = arith.constant 0 : i32
    return %c0_i32, %c0_i32_0 : i32, i32
  }
  func.func @transform_6(%arg0: i32, %arg1: i32) -> (i32, i32) {
    %c0_i32 = arith.constant 0 : i32
    %c0_i32_0 = arith.constant 0 : i32
    %c0_i32_1 = arith.constant 0 : i32
    return %c0_i32, %c0_i32_0 : i32, i32
  }
  func.func @transform_7(%arg0: i32, %arg1: i32) -> (i32, i32) {
    %c0_i32 = arith.constant 0 : i32
    %c0_i32_0 = arith.constant 0 : i32
    %c0_i32_1 = arith.constant 0 : i32
    return %c0_i32, %c0_i32_0 : i32, i32
  }
  func.func @transform_8(%arg0: i32, %arg1: i32) -> (i32, i32) {
    %c0_i32 = arith.constant 0 : i32
    %c0_i32_0 = arith.constant 0 : i32
    %c0_i32_1 = arith.constant 0 : i32
    return %c0_i32, %c0_i32_0 : i32, i32
  }
  func.func @transform_9(%arg0: i32, %arg1: i32) -> (i32, i32) {
    %c0_i32 = arith.constant 0 : i32
    %c0_i32_0 = arith.constant 0 : i32
    %c0_i32_1 = arith.constant 0 : i32
    return %c0_i32, %c0_i32_0 : i32, i32
  }
  func.func @transform_10(%arg0: i32, %arg1: i32) -> (i32, i32) {
    %c0_i32 = arith.constant 0 : i32
    %c0_i32_0 = arith.constant 0 : i32
    %c0_i32_1 = arith.constant 0 : i32
    return %c0_i32, %c0_i32_0 : i32, i32
  }
  func.func @transform_11(%arg0: i32, %arg1: i32) -> (i32, i32) {
    %c0_i32 = arith.constant 0 : i32
    %c0_i32_0 = arith.constant 0 : i32
    %c0_i32_1 = arith.constant 0 : i32
    return %c0_i32, %c0_i32_0 : i32, i32
  }
  func.func @transform_12(%arg0: i32, %arg1: i32) -> (i32, i32) {
    %c0_i32 = arith.constant 0 : i32
    %c0_i32_0 = arith.constant 0 : i32
    %c0_i32_1 = arith.constant 0 : i32
    return %c0_i32, %c0_i32_0 : i32, i32
  }
  func.func @transform_13(%arg0: i32, %arg1: i32) -> (i32, i32) {
    %c0_i32 = arith.constant 0 : i32
    %c0_i32_0 = arith.constant 0 : i32
    %c0_i32_1 = arith.constant 0 : i32
    return %c0_i32, %c0_i32_0 : i32, i32
  }
  func.func @transform_14(%arg0: i32, %arg1: i32) -> (i32, i32) {
    %c0_i32 = arith.constant 0 : i32
    %c0_i32_0 = arith.constant 0 : i32
    %c0_i32_1 = arith.constant 0 : i32
    return %c0_i32, %c0_i32_0 : i32, i32
  }
  func.func @transform_15(%arg0: i32, %arg1: i32) -> (i32, i32) {
    %c0_i32 = arith.constant 0 : i32
    %c0_i32_0 = arith.constant 0 : i32
    %c0_i32_1 = arith.constant 0 : i32
    return %c0_i32, %c0_i32_0 : i32, i32
  }
  func.func @transform_16(%arg0: i32, %arg1: i32) -> (i32, i32) {
    %c0_i32 = arith.constant 0 : i32
    %c0_i32_0 = arith.constant 0 : i32
    %c0_i32_1 = arith.constant 0 : i32
    return %c0_i32, %c0_i32_0 : i32, i32
  }
  func.func @transform_17(%arg0: i32, %arg1: i32) -> (i32, i32) {
    %c0_i32 = arith.constant 0 : i32
    %c0_i32_0 = arith.constant 0 : i32
    %c0_i32_1 = arith.constant 0 : i32
    return %c0_i32, %c0_i32_0 : i32, i32
  }
  func.func @transform_18(%arg0: i32, %arg1: i32) -> (i32, i32, i32) {
    %c0_i32 = arith.constant 0 : i32
    %c0_i32_0 = arith.constant 0 : i32
    return %arg0, %arg1, %c0_i32 : i32, i32, i32
  }
  func.func @transform_19(%arg0: i32, %arg1: i32) -> (i32, i32, i32, i32) {
    %c0_i32 = arith.constant 0 : i32
    %c0_i32_0 = arith.constant 0 : i32
    %c0_i32_1 = arith.constant 0 : i32
    return %arg0, %c0_i32, %arg1, %c0_i32_0 : i32, i32, i32, i32
  }
}

</mosaic_0001>

<bundles_post_ra>
// kernel: tpu_custom_call.1
= control target key start
LH: loop header
LB: loop body
LE: loop exit
PB: predicated region body
PF: predicated region fallthrough
CT: control target
= control target key end

     0   :  { %s3200_s0 = inlined_call_operand.hbm [shape: bf16[2,8,32], index: 0, kind: input, shape index: {}]   ;;  %s3201_s1 = inlined_call_operand.vmem [shape: f32[2,1,8], index: 1, kind: input, shape index: {}]   ;;  %s3202_s2 = inlined_call_operand.vmem [shape: bf16[32,32], index: 2, kind: input, shape index: {}]   ;;  %s3203_s3 = inlined_call_operand.hbm [shape: f32[1,32], index: 3, kind: input, shape index: {}]   ;;  %s3204_s4 = inlined_call_operand.vmem [shape: bf16[32,32], index: 4, kind: input, shape index: {}]   ;;  %s3205_s5 = inlined_call_operand.hbm [shape: f32[1,32], index: 5, kind: input, shape index: {}]   ;;  %s3206_s6 = inlined_call_operand.vmem [shape: bf16[32,32], index: 6, kind: input, shape index: {}]   ;;  %s3207_s7 = inlined_call_operand.hbm [shape: f32[1,32], index: 7, kind: input, shape index: {}]   ;;  %s3208_s8 = inlined_call_operand.hbm [shape: bf16[32,32], index: 8, kind: input, shape index: {}]   ;;  %s3209_s9 = inlined_call_operand.hbm [shape: f32[1,32], index: 9, kind: input, shape index: {}]   ;;  %s3210_s10 = inlined_call_operand.vmem [shape: f32[1,32], index: 10, kind: input, shape index: {}]   ;;  %s3211_s11 = inlined_call_operand.vmem [shape: f32[1,32], index: 11, kind: input, shape index: {}]   ;;  %s3212_s12 = inlined_call_operand.vmem [shape: bf16[32,64], index: 12, kind: input, shape index: {}]   ;;  %s3213_s13 = inlined_call_operand.vmem [shape: f32[1,64], index: 13, kind: input, shape index: {}]   ;;  %s3214_s14 = inlined_call_operand.vmem [shape: bf16[64,32], index: 14, kind: input, shape index: {}]   ;;  %s3215_s15 = inlined_call_operand.vmem [shape: f32[1,32], index: 15, kind: input, shape index: {}]   ;;  %s3216_s16 = inlined_call_operand.vmem [shape: f32[1,32], index: 16, kind: input, shape index: {}]   ;;  %s3217_s17 = inlined_call_operand.vmem [shape: f32[1,32], index: 17, kind: input, shape index: {}]   ;;  %s3218_s18 = inlined_call_operand.hbm [shape: f32[2,8,32], index: 18, kind: output, shape index: {0}]   ;;  %s3219_s19 = inlined_call_operand.hbm [shape: bf16[2,4,8,8], index: 19, kind: output, shape index: {1}]  }
   0x1   :  { %3245 = sst [smem:[#allocation29_spill]] %s3200_s0 }
   0x2   :  { %3246 = sst [smem:[#allocation30_spill]] %s3201_s1 }
   0x3   :  { %3247 = sst [smem:[#allocation31_spill]] %s3202_s2 }
   0x4   :  { %3248 = sst [smem:[#allocation32_spill]] %s3203_s3 }
   0x5   :  { %3249 = sst [smem:[#allocation33_spill]] %s3205_s5 }
   0x6   :  { %3250 = sst [smem:[#allocation34_spill]] %s3207_s7 }
   0x7   :  { %3251 = sst [smem:[#allocation35_spill]] %s3213_s13 }
   0x8   :  { %3252 = sst [smem:[#allocation36_spill]] %s3214_s14 }
   0x9   :  { %3253 = sst [smem:[#allocation37_spill]] %s3215_s15 }
   0xa   :  { %3254 = sst [smem:[#allocation38_spill]] %s3216_s16 }
   0xb   :  { %3255 = sst [smem:[#allocation39_spill]] %s3217_s17 }
   0xc   :  { %3256 = sst [smem:[#allocation40_spill]] %s3218_s18 }
   0xd   :  { %3257 = sst [smem:[#allocation41_spill]] %s3219_s19 }
   0xe   :  { %25 = vsyncpa [#allocation5], 0 }
   0xf   :  { %26 = vsyncpa [#allocation8], 0 }
  0x10   :  { %27 = vsyncpa [#allocation11], 0 }
  0x11   :  { %28 = vsyncpa [#allocation14], 0 }
  0x12   :  { %29 = vsyncpa [#allocation6], 0 }
  0x13   :  { %31 = vsyncpa [#allocation6 + $0x1], 0 }
  0x14   :  { %32 = vsyncpa [#allocation17], 0 }
  0x15   :  { %34 = vsyncpa [#allocation17 + $0x1], 0  ;;  %s2706_s0 = smov 0   ;;  %s2708_s30 = smov 0  }
  0x16   :  { %s2710_s20 = smov 0   ;;  %s2712_s21 = smov 0  }
  0x17   :  { %s2714_s1 = smov 0   ;;  %s2716_s22 = smov 0  }
  0x18 LB: > { %3258 = sst [smem:[#allocation24_spill]] %s2564_s0  ;;  %s2586_s2 = smov [#allocation7]   ;;  %s2584_s22 = sphi %s2716_s22, %s40_s22   ;;  %s2580_s1 = sphi %s2714_s1, %s3299_s1   ;;  %s2576_s21 = sphi %s2712_s21, %s3298_s21   ;;  %s2572_s20 = sphi %s2710_s20, %s3297_s20   ;;  %s2568_s30 = sphi %s2708_s30, %s3301_s30   ;;  %s2564_s0 = sphi %s2706_s0, %s3300_s0  }
  0x19   : > { %3259 = sst [smem:[#allocation25_spill]] %s2572_s20  ;;  %s530_s23 = sshll.u32 %s2586_s2, 4  ;;  %s531_s23 = int_to_ptr.vmem [resolvable:$true] %s530_s23 }
  0x1a   : > { %3260 = sst [smem:[#allocation26_spill]] %s2580_s1  ;;  %s3223_s24 = sadd.s32 4294967295, %s2584_s22  }
  0x1b   : > { %p1909_p0 = scmp.ge.s32.totalorder %s2584_s22, 1  ;;  %p2740_p1 = scmp.eq.s32.totalorder %s3223_s24, 0 }
  0x1c   : > { %p501_p2 = scmp.lt.s32.totalorder %s2584_s22, 3  ;;  %s2587_s26 = smov [#allocation10]  }
  0x1d   : > { %s3261_s25 = scalar_select %p2740_p1, 1, 0 }
  0x1e   : > { %p2745_p3 = pnand %p1909_p0, %p501_p2  ;;  %s558_s27 = sshll.u32 %s2587_s26, 4  ;;  %s2751_s27 = int_to_ptr.vmem [resolvable:$true] %s558_s27 }
  0x1f   : > { %s3264_s24 = sld [smem:[#allocation32_spill]] }
  0x20   : > { %s3262_s3 = scalar_select %p2745_p3, 1, 0 }
  0x21   : > { %p3226_p4 = pneg %p2745_p3 }
  0x23   : > { %p2758_p5 = pnand %p3226_p4, %p2740_p1 }
  0x25   : > { %s3263_s28 = scalar_select %p2758_p5, 1, 0 }
  0x26   : > { %s2288_s18 = scalar_lea.hbm %s3264_s24, 16  ;;  %p2770_p7 = pneg %p2758_p5 }
  0x27   : > { %p2289_p6 = scmp.ne.s32.totalorder %s3264_s24, %s2288_s18  ;;  %p2295_p10 = scmp.lt.u32.totalorder %s2288_s18, %s3264_s24 }
  0x28   : > { %s3265_s26 = scalar_select %p2770_p7, 1, 0 }
  0x29   : > { %p2291_p8 = pnand %p2770_p7, %p2289_p6 }
  0x2b   : > { %p2292_p9 = pneg %p2291_p8 }
  0x2d   : > { %p2297_p11 = pnand %p2295_p10, %p2292_p9 }
  0x2f   : > { %2300 = shalt.err (!%p2297_p11)
}
  0x30   : > { %s2301_s29 = scalar_lea.vmem %s531_s23, 16  ;;  %s2308_s16 = scalar_lea.vmem %s531_s23, 32 }
  0x31   : > { %p2302_p12 = scmp.ne.s32.totalorder %s531_s23, %s2301_s29  ;;  %p2309_p2 = scmp.lt.s32.totalorder %s531_s23, %s531_s23 }
  0x32   : > { %p2310_p4 = scmp.lt.s32.totalorder %s2308_s16, %s2301_s29 }
  0x33   : > { %p2304_p13 = pnand %p2302_p12, %p2770_p7 }
  0x34   : > { %p2311_p3 = por %p2310_p4, %p2309_p2 }
  0x35   : > { %p2305_p0 = pneg %p2304_p13 }
  0x37   : > { %p2312_p1 = pnand %p2311_p3, %p2305_p0 }
  0x39   : > { %2315 = shalt.err (!%p2312_p1)
}
  0x3a   : > { %2149 = dma.hbm_to_vmem [thread:$0]  (!%p2758_p5), %s3264_s24, 16, %s531_s23, [#allocation8]  }
  0x3b   : > { %s3266_s7 = sld [smem:[#allocation34_spill]] }
  0x41   : > { %s2316_s19 = scalar_lea.hbm %s3266_s7, 16 }
  0x42   : > { %p2317_p6 = scmp.ne.s32.totalorder %s3266_s7, %s2316_s19  ;;  %p2323_p1 = scmp.lt.u32.totalorder %s2316_s19, %s3266_s7 }
  0x44   : > { %p2319_p8 = pnand %p2317_p6, %p2770_p7 }
  0x46   : > { %p2320_p4 = pneg %p2319_p8 }
  0x48   : > { %p2325_p3 = pnand %p2323_p1, %p2320_p4 }
  0x4a   : > { %2328 = shalt.err (!%p2325_p3)
}
  0x4b   : > { %s2329_s23 = scalar_lea.vmem %s2751_s27, 16  ;;  %s2336_s13 = scalar_lea.vmem %s2751_s27, 32 }
  0x4c   : > { %p2330_p9 = scmp.ne.s32.totalorder %s2751_s27, %s2329_s23  ;;  %p2337_p12 = scmp.lt.s32.totalorder %s2751_s27, %s2751_s27 }
  0x4d   : > { %p2338_p13 = scmp.lt.s32.totalorder %s2336_s13, %s2329_s23 }
  0x4e   : > { %p2332_p10 = pnand %p2330_p9, %p2770_p7 }
  0x4f   : > { %p2339_p0 = por %p2338_p13, %p2337_p12 }
  0x50   : > { %p2333_p11 = pneg %p2332_p10 }
  0x52   : > { %p2340_p2 = pnand %p2339_p0, %p2333_p11 }
  0x54   : > { %2343 = shalt.err (!%p2340_p2)
}
  0x55   : > { %2155 = dma.hbm_to_vmem [thread:$0]  (!%p2758_p5), %s3266_s7, 16, %s2751_s27, [#allocation11]  }
  0x56   : > { %s1908_s2 = sadd.s32 4294967294, %s2584_s22   ;;  %s52_s15 = sadd.s32 1, %s2580_s1 }
  0x57   : > { %s59_s18 = sadd.s32 1, %s2572_s20  ;;  %p54_p6 = scmp.ge.s32.totalorder %s52_s15, 2 }
  0x58   : > { %p72_p8 = scmp.ne.s32.totalorder %s2568_s30, %s2564_s0  ;;  %p459_p4 = scmp.ne.s32.totalorder %s2572_s20, %s2568_s30 }
  0x59   : > { %s3267_s19 = sadd.s32 4294967295, %s2584_s22   ;;  %s3303_s15 = smov (%p54_p6, %s52_s15), 0 }
  0x5a   : > { %p460_p1 = scmp.eq.s32.totalorder %s3267_s19, 1  ;;  %3268 = sst [smem:[#allocation27_spill]] %s3303_s15 }
  0x5b   : > { %p3269_p3 = scmp.ne.s32.totalorder %s3261_s25, 0  ;;  %s56_s16 = ssub.s32 %s2580_s1, %s3303_s15 }
  0x5c   : > { %p2827_p10 = por %p460_p1, %p459_p4  ;;  %p466_p11 = scmp.eq.s32.totalorder %s1908_s2, 1 }
  0x5d   : > { %p2823_p9 = por %p3269_p3, %p72_p8  ;;  %p57_p12 = scmp.eq.s32.totalorder %s56_s16, 0 }
  0x5e   : > { %s3271_s27 = scalar_select %p2827_p10, 1, 0 }
  0x5f   : > { %s3270_s29 = scalar_select %p2823_p9, 1, 0 }
  0x60   : > { %s1910_s23 = sshll.u32 %s2576_s21, 6  ;;  %p2834_p13 = por %p466_p11, %p72_p8 }
  0x61   : > { %s3273_s19 = sld [smem:[#allocation29_spill]]  ;;  %p3275_p0 = scmp.ne.s32.totalorder %s3262_s3, 0 }
  0x62   : > { %s3272_s13 = scalar_select %p2834_p13, 1, 0 }
  0x63   : > { %s2842_s24 = scalar_select %p57_p12, %s2572_s20, %s59_s18  }
  0x64   : > { %p3276_p2 = pneg %p3275_p0  ;;  %s2588_s2 = smov [#allocation4]  }
  0x65   : > { %3274 = sst [smem:[#allocation28_spill]] %s2842_s24  ;;  %s516_s16 = sshll.u32 %s2588_s2, 4  ;;  %s517_s16 = int_to_ptr.vmem [resolvable:$true] %s516_s16 }
  0x66   : > { %p2849_p6 = pnand %p3276_p2, %p2823_p9 }
  0x67   : > { %s514_s7 = scalar_lea.hbm %s3273_s19, %s1910_s23  ;;  %s2349_s14 = scalar_lea.hbm %s3273_s19, 128 }
  0x68   : > { %s2344_s15 = scalar_lea.hbm %s514_s7, 64  ;;  %p2346_p4 = pneg %p2849_p6 }
  0x69   : > { %p2345_p8 = scmp.ne.s32.totalorder %s514_s7, %s2344_s15  ;;  %p2350_p11 = scmp.lt.u32.totalorder %s514_s7, %s3273_s19 }
  0x6a   : > { %p2351_p12 = scmp.lt.u32.totalorder %s2349_s14, %s2344_s15  ;;  %p2353_p13 = scmp.lt.u32.totalorder %s2344_s15, %s514_s7 }
  0x6b   : > { %p2347_p1 = pnand %p2346_p4, %p2345_p8 }
  0x6c   : > { %p2352_p2 = por %p2351_p12, %p2350_p11 }
  0x6d   : > { %p2348_p3 = pneg %p2347_p1 }
  0x6e   : > { %p2354_p10 = por %p2353_p13, %p2352_p2 }
  0x70   : > { %p2355_p9 = pnand %p2354_p10, %p2348_p3 }
  0x72   : > { %2358 = shalt.err (!%p2355_p9)
}
  0x73   : > { %s2359_s2 = scalar_lea.vmem %s517_s16, 64  ;;  %p2367_p5 = scmp.lt.s32.totalorder %s517_s16, %s517_s16 }
  0x74   : > { %p2360_p0 = scmp.ne.s32.totalorder %s517_s16, %s2359_s2  ;;  %p2368_p7 = scmp.lt.s32.totalorder %s2359_s2, %s2359_s2 }
  0x76   : > { %p2362_p8 = pnand %p2360_p0, %p2346_p4  ;;  %p2369_p11 = por %p2368_p7, %p2367_p5 }
  0x78   : > { %p2363_p1 = pneg %p2362_p8 }
  0x7a   : > { %p2370_p12 = pnand %p2369_p11, %p2363_p1 }
  0x7c   : > { %2373 = shalt.err (!%p2370_p12)
}
  0x7d   : > { %2146 = dma.hbm_to_vmem [thread:$0]  (!%p2849_p6), %s514_s7, 64, %s517_s16, [#allocation5]  }
  0x7e   : > { %s2589_s1 = smov [#allocation9]   ;;  %s2590_s18 = smov [#allocation12]  }
  0x7f   : > { %s544_s15 = sshll.u32 %s2589_s1, 4  ;;  %s568_s23 = sshll.u32 %s2590_s18, 4  ;;  %s545_s15 = int_to_ptr.vmem [resolvable:$true] %s544_s15  ;;  %s569_s23 = int_to_ptr.vmem [resolvable:$true] %s568_s23 }
  0x80   : > { %s3278_s5 = sld [smem:[#allocation33_spill]]  ;;  %p3279_p5 = scmp.ne.s32.totalorder %s3265_s26, 0 }
  0x86   : > { %s2374_s19 = scalar_lea.hbm %s3278_s5, 16 }
  0x87   : > { %p2375_p9 = scmp.ne.s32.totalorder %s3278_s5, %s2374_s19  ;;  %p2381_p13 = scmp.lt.u32.totalorder %s2374_s19, %s3278_s5 }
  0x89   : > { %p2377_p7 = pnand %p2375_p9, %p3279_p5 }
  0x8b   : > { %p2378_p10 = pneg %p2377_p7 }
  0x8d   : > { %p2383_p0 = pnand %p2381_p13, %p2378_p10 }
  0x8f   : > { %2386 = shalt.err (!%p2383_p0)
}
  0x90   : > { %s2387_s7 = scalar_lea.vmem %s545_s15, 16  ;;  %s2394_s16 = scalar_lea.vmem %s545_s15, 32 }
  0x91   : > { %p2388_p6 = scmp.ne.s32.totalorder %s545_s15, %s2387_s7  ;;  %p2395_p2 = scmp.lt.s32.totalorder %s545_s15, %s545_s15 }
  0x92   : > { %p2396_p8 = scmp.lt.s32.totalorder %s2394_s16, %s2387_s7 }
  0x93   : > { %p2390_p4 = pnand %p2388_p6, %p3279_p5 }
  0x94   : > { %p2397_p1 = por %p2396_p8, %p2395_p2 }
  0x95   : > { %p2391_p3 = pneg %p2390_p4 }
  0x97   : > { %p2398_p11 = pnand %p2397_p1, %p2391_p3 }
  0x99   : > { %2401 = shalt.err (!%p2398_p11)
}
  0x9a   : > { %p3280_p12 = scmp.ne.s32.totalorder %s3263_s28, 0  ;;  %s2402_s18 = scalar_lea.hbm %s3208_s8, 256 }
  0x9b   : > { %p2403_p9 = scmp.ne.s32.totalorder %s3208_s8, %s2402_s18  ;;  %p2409_p13 = scmp.lt.u32.totalorder %s2402_s18, %s3208_s8 }
  0x9c   : > { %2152 = dma.hbm_to_vmem [thread:$0]  (!%p3280_p12), %s3278_s5, 16, %s545_s15, [#allocation8]  }
  0x9d   : > { %p2405_p7 = pnand %p2403_p9, %p3279_p5 }
  0x9f   : > { %p2406_p10 = pneg %p2405_p7 }
  0xa1   : > { %p2411_p0 = pnand %p2409_p13, %p2406_p10 }
  0xa3   : > { %2414 = shalt.err (!%p2411_p0)
}
  0xa4   : > { %s2415_s7 = scalar_lea.vmem %s569_s23, 256  ;;  %p2423_p2 = scmp.lt.s32.totalorder %s569_s23, %s569_s23 }
  0xa5   : > { %p2416_p6 = scmp.ne.s32.totalorder %s569_s23, %s2415_s7  ;;  %p2424_p8 = scmp.lt.s32.totalorder %s2415_s7, %s2415_s7 }
  0xa7   : > { %p2418_p4 = pnand %p2416_p6, %p3279_p5  ;;  %p2425_p1 = por %p2424_p8, %p2423_p2 }
  0xa9   : > { %p2419_p3 = pneg %p2418_p4 }
  0xab   : > { %p2426_p11 = pnand %p2425_p1, %p2419_p3 }
  0xad   : > { %2429 = shalt.err (!%p2426_p11)
}
  0xae   : > { %s2591_s15 = smov 64   ;;  %s2592_s16 = smov 4  }
  0xaf   : > { %2158 = dma.hbm_to_vmem [thread:$0]  (!%p3280_p12), %s3208_s8, 256, %s569_s23, [#allocation11], %s2591_s15, %s2591_s15, %s2592_s16  }
  0xb0   : > { %s2593_s19 = smov [#allocation13]   ;;  %s2430_s17 = scalar_lea.hbm %s3209_s9, 16 }
  0xb1   : > { %s582_s1 = sshll.u32 %s2593_s19, 4  ;;  %p2431_p9 = scmp.ne.s32.totalorder %s3209_s9, %s2430_s17  ;;  %s583_s1 = int_to_ptr.vmem [resolvable:$true] %s582_s1 }
  0xb2   : > { %p2437_p13 = scmp.lt.u32.totalorder %s2430_s17, %s3209_s9 }
  0xb3   : > { %p2433_p7 = pnand %p2431_p9, %p3279_p5 }
  0xb5   : > { %p2434_p10 = pneg %p2433_p7 }
  0xb7   : > { %p2439_p0 = pnand %p2437_p13, %p2434_p10 }
  0xb9   : > { %2442 = shalt.err (!%p2439_p0)
}
  0xba   : > { %s2443_s23 = scalar_lea.vmem %s583_s1, 16  ;;  %s2450_s15 = scalar_lea.vmem %s583_s1, 32 }
  0xbb   : > { %p2444_p6 = scmp.ne.s32.totalorder %s583_s1, %s2443_s23  ;;  %p2451_p2 = scmp.lt.s32.totalorder %s583_s1, %s583_s1 }
  0xbc   : > { %p2452_p8 = scmp.lt.s32.totalorder %s2450_s15, %s2443_s23 }
  0xbd   : > { %p2446_p4 = pnand %p2444_p6, %p3279_p5 }
  0xbe   : > { %p2453_p1 = por %p2452_p8, %p2451_p2 }
  0xbf   : > { %p2447_p3 = pneg %p2446_p4 }
  0xc1   : > { %p2454_p11 = pnand %p2453_p1, %p2447_p3 }
  0xc3   : > { %2457 = shalt.err (!%p2454_p11)
}
  0xc4   : > { %2161 = dma.hbm_to_vmem [thread:$0]  (!%p3280_p12), %s3209_s9, 16, %s583_s1, [#allocation14]  }
  0xc5   : > { %p3281_p9 = scmp.ne.s32.totalorder %s3262_s3, 0 }
  0xc6   : > { %p3282_p7 = scmp.ne.s32.totalorder (!%p3281_p9), %s3270_s29, 0 }
  0xc7   : > { %625 = sbr.rel (%p3281_p9) target bundleno = 2765 (0xacd), region = 92 }
  0xce   : > { %2539 = dma.done.wait (%p3282_p7), [#allocation5], 64  }
  0xcf   : > { %2541 = vsyncadd (%p3282_p7), [#allocation5], 4294967232  ;;  %p3283_p5 = scmp.ne.s32.totalorder %s3261_s25, 0 }
  0xd1   : > { %2543 = dma.done.wait (%p3283_p5), [#allocation8], 32  }
  0xd2   : > { %2545 = vsyncadd (%p3283_p5), [#allocation8], 4294967264 }
  0xd3   : > { %2547 = dma.done.wait (%p3283_p5), [#allocation11], 272  }
  0xd4   : > { %2549 = vsyncadd (%p3283_p5), [#allocation11], 4294967024 }
  0xd5   : > { %2551 = dma.done.wait (%p3283_p5), [#allocation14], 16  }
  0xd6   : > { %2553 = vsyncadd (%p3283_p5), [#allocation14], 4294967280  ;;  %v2594_v0 = vmov 0.0   ;;  %vm2595_vm0 = vmmov 0   ;;  %v2246_v1 = vld [vmem:[%s3204_s4] sm:$0xff]   ;;  %v2247_v2 = vld [vmem:[%s3204_s4 + $0x8] sm:$0xff]  }
  0xd7   : > { %2017 = vmatprep.subr.bf16.mxu0 %v2594_v0  ;;  %2021 = vmatprep.mubr.msk.bf16.mxu0 %vm2595_vm0, %v2594_v0  ;;  %v712_v3 = vld [vmem:[#allocation4] sm:$0xf]  ;;  %vm736_vm1 = vcmask 261120   ;;  %s3284_s24 = sld [smem:[#allocation31_spill]]  ;;  %v2250_v7 = vld [vmem:[%s3206_s6] sm:$0xff]   ;;  %vm844_vm2 = vcmask 257024  }
  0xd8   : > { %2025 = vmatprep.subr.bf16.mxu1 %v2594_v0  ;;  %2029 = vmatprep.mubr.msk.bf16.mxu1 %vm2595_vm0, %v2594_v0  ;;  %v2965_v6 = vld [vmem:[#allocation4] sm:$0xf]  ;;  %v1925_v9 = vld [vmem:[#allocation9] ss:$0 sm:$0xff]  ;;  %v1933_v16 = vld [vmem:[#allocation7] ss:$0 sm:$0xff] }
  0xd9   : > { %2018 = vmatpush3.bf16.msra.mxu0 %v2246_v1  ;;  %2026 = vmatpush3.bf16.msra.mxu1 %v2250_v7  ;;  %v2251_v8 = vld [vmem:[%s3206_s6 + $0x8] sm:$0xff]   ;;  %vm931_vm3 = vcmask 64512   ;;  %s2596_s0 = smov 112   ;;  %s2597_s7 = smov 120   ;;  %v1929_v28 = vld [vmem:[#allocation10] ss:$0 sm:$0xff] }
  0xda   : > { %2019 = vmatprep.subr.bf16.mxu0 %v2594_v0  ;;  %2027 = vmatprep.subr.bf16.mxu1 %v2594_v0  ;;  %s2598_s23 = smov 104   ;;  %vm996_vm4 = vcmask 1043456   ;;  %p704_p12 = scmp.lt.s32.totalorder %s2576_s21, 1  ;;  %vm990_vm5 = vcmask 60416   ;;  %vm1414_vm6 = vcmask 130048   ;;  %vm1416_vm7 = vcmask 195584  }
  0xdb   : > { %s3285_s5 = sld [smem:[#allocation30_spill]]  ;;  %s3029_s28 = sand.u32 1, %s2568_s30   ;;  %vm1632_vm8 = vcmask 523264  }
  0xdc   : > { %s705_s15 = scalar_select %p704_p12, %s2576_s21, 1 }
  0xdd   : > { %v2248_v4 = vld [vmem:[%s3284_s24] sm:$0xff]   ;;  %2020 = vmatpush3.bf16.msra.mxu0 %v2247_v2  ;;  %v2249_v5 = vld [vmem:[%s3284_s24 + $0x8] sm:$0xff]   ;;  %2028 = vmatpush3.bf16.msra.mxu1 %v2251_v8  ;;  %s1924_s25 = sshll.u32 %s3029_s28, 4  ;;  %s2599_s29 = smov 8  }
  0xde   : > { %2033 = vmatprep.subr.bf16.mxu0 %v2594_v0  ;;  %2041 = vmatprep.subr.bf16.mxu1 %v2594_v0  ;;  %s3035_s26 = scalar_lea.vmem [#allocation16], %s1924_s25  ;;  %s2600_s19 = smov 16  }
  0xdf   : > { %s2601_s1 = smov 24   ;;  %s3287_s2 = sld [smem:[#allocation35_spill]] }
  0xe0   : > { %2022 = vmatmul.mubr.msk.bf16.vlgmr.msra.gmra.mrb[0].mxu0 %vm736_vm1, %v712_v3  ;;  %2030 = vmatmul.mubr.msk.bf16.vlgmr.msra.gmra.mrb[0].mxu1 %vm736_vm1, %v712_v3  ;;  %s1980_s16 = sshll.u32 %s2576_s21, 8  ;;  %s3289_s25 = sld [smem:[#allocation41_spill]] }
  0xe1   : > { %2034 = vmatpush3.bf16.msra.mxu0 %v2248_v4  ;;  %2037 = vmatprep.mubr.msk.bf16.mxu0 %vm2595_vm0, %v2594_v0  ;;  %s706_s3 = scalar_lea.vmem %s3285_s5, %s705_s15  ;;  %s3286_s5 = sld [smem:[#allocation36_spill]] }
  0xe2   : > { %2035 = vmatprep.subr.bf16.mxu0 %v2594_v0  ;;  %2043 = vmatprep.mubr.msk.bf16.mxu1 %vm2595_vm0, %v2594_v0  ;;  %v1937_v46 = vld [vmem:[%s706_s3] ss:$0 sm:$0xff]  ;;  %s1741_s15 = sshll.u32 %s3035_s26, 4  ;;  %p3290_p13 = scmp.ne.s32.totalorder %s3271_s27, 0  ;;  %s3109_s15 = int_to_ptr.vmem [resolvable:$true] %s1741_s15 }
  0xe3   : > { %s2602_s18 = smov [#allocation16]  }
  0xe4   : > { %s2462_s14 = sshll.u32 %s2602_s18, 4  ;;  %s2463_s14 = int_to_ptr.vmem [resolvable:$false] %s2462_s14 }
  0xe5   : > { %2036 = vmatpush3.bf16.msra.mxu0 %v2249_v5  ;;  %p2465_p4 = scmp.lt.s32.totalorder %s3109_s15, %s2463_s14 }
  0xe6   : > { %2047 = vmatprep.subr.bf16.mxu0 %v2594_v0 }
  0xe8   : > { %2038 = vmatmul.mubr.msk.bf16.vlgmr.msra.gmra.mrb[4].mxu0 %vm736_vm1, %v2965_v6 }
  0xe9   : > { %2049 = vmatprep.mubr.msk.bf16.mxu0 %vm2595_vm0, %v2594_v0 }
 0x1b3   : > { %v774_v10 = vpop.f32.mrb[0].mxu0  ;;  %v837_v29 = vpop.f32.mrb[0].mxu1 }
 0x1b4   : > { %v775_v11 = vadd.f32 %v1925_v9, %v774_v10  ;;  %v2023_v12 = vpop.f32.mrb[1].mxu0  ;;  %v838_v30 = vadd.f32 %v1929_v28, %v837_v29  ;;  %v2031_v31 = vpop.f32.mrb[1].mxu1 }
 0x1b5   : > { %v777_v13 = vpop.f32.mrb[2].mxu0  ;;  %v840_v32 = vpop.f32.mrb[2].mxu1 }
 0x1b6   : > { %v843_v14 = vpack.c.bf16 %v775_v11, %v775_v11  ;;  %v2024_v15 = vpop.f32.mrb[3].mxu0  ;;  %v846_v33 = vpack.c.bf16 %v838_v30, %v838_v30  ;;  %v2032_v34 = vpop.f32.mrb[3].mxu1 }
 0x1b8   : > { %845 = vst.msk [vmem:[#allocation2] sm:$0xf] %vm844_vm2, %v843_v14  ;;  %847 = vst.msk [vmem:[#allocation3] sm:$0xf] %vm844_vm2, %v846_v33 }
 0x1bb   : > { %v917_v17 = vpop.f32.mrb[4].mxu0 }
 0x1bc   : > { %v2039_v18 = vpop.f32.mrb[5].mxu0  ;;  %v918_v19 = vadd.f32 %v1933_v16, %v917_v17 }
 0x1bd   : > { %v920_v20 = vpop.f32.mrb[6].mxu0 }
 0x1be   : > { %v2040_v21 = vpop.f32.mrb[7].mxu0  ;;  %v923_v26 = vpack.c.bf16 %v918_v19, %v918_v19 }
 0x1bf   : > { %v924_v22 = vld [vmem:[#allocation2] sm:$0xf]  ;;  %v992_v35 = vld [vmem:[#allocation3] sm:$0xf] }
 0x1c0   : > { %v2252_v23 = vld [vmem:[#allocation2] ss:$0 sps:$4 sm:$0xff]   ;;  %v936_v24 = vsel %vm931_vm3, %v924_v22, 0  ;;  %v998_v36 = vsel %vm996_vm4, %v992_v35, 0  ;;  %v2255_v14 = vld [vmem:[#allocation3] ss:$0 sps:$4 sm:$0xff]  }
 0x1c1   : > { %v2253_v25 = vld [vmem:[#allocation2] ss:$0 sps:$4 sm:$0xff]   ;;  %2042 = vmatpush3.bf16.xpose.msra.mxu1 %v936_v24  ;;  %1167 = vrot.lane.b32.xlu1 %v2252_v23, %s2596_s0  ;;  %v2256_v30 = vld [vmem:[#allocation3] ss:$0 sps:$4 sm:$0xff]  }
 0x1c2   : > { %1047 = vrot.lane.b32.xlu0 %v2253_v25, %s2597_s7  ;;  %2053 = vmatprep.subr.bf16.mxu1 %v2594_v0  ;;  %v2254_v27 = vld [vmem:[#allocation2] ss:$0 sps:$4 sm:$0xff]   ;;  %v2257_v34 = vld [vmem:[#allocation3] ss:$0 sps:$4 sm:$0xff]  }
 0x1c3   : > { %2048 = vmatpush3.bf16.msra.mxu0 %v998_v36 }
 0x1c4   : > { %2059 = vmatprep.subr.bf16.mxu0 %v2594_v0 }
 0x1c5   : > { %1162 = vrot.lane.b32.xlu1 %v923_v26, %s2596_s0 }
 0x1c6   : > { %1042 = vrot.lane.b32.xlu0 %v923_v26, %s2597_s7 }
 0x1c8   : > { %2044 = vmatmul.mubr.msk.bf16.vlgmr.msra.gmra.mrb[4].mxu1 %vm931_vm3, %v923_v26 }
 0x1c9   : > { %1282 = vrot.lane.b32.xlu1 %v923_v26, %s2598_s23  ;;  %2055 = vmatprep.mubr.msk.bf16.mxu1 %vm2595_vm0, %v2594_v0 }
 0x1ca   : > { %1287 = vrot.lane.b32.xlu0 %v2254_v27, %s2598_s23 }
 0x233   : > { %v1168_v39 = vpop.permute.xlu1 %1167 }
 0x234   : > { %v1048_v37 = vpop.permute.xlu0 %1047  ;;  %v1173_v41 = vsel %vm931_vm3, %v1168_v39, 0 }
 0x235   : > { %v1053_v38 = vsel %vm931_vm3, %v1048_v37, 0 }
 0x236   : > { %2054 = vmatpush3.bf16.xpose.msra.mxu1 %v1053_v38 }
 0x237   : > { %2065 = vmatprep.subr.bf16.mxu1 %v2594_v0  ;;  %v1163_v43 = vpop.permute.xlu1 %1162 }
 0x238   : > { %v1043_v40 = vpop.permute.xlu0 %1042 }
 0x23b   : > { %v1283_v45 = vpop.permute.xlu1 %1282 }
 0x23c   : > { %v1288_v42 = vpop.permute.xlu0 %1287 }
 0x23d   : > { %2056 = vmatmul.mubr.msk.bf16.vlgmr.msra.gmra.mrb[8].mxu1 %vm931_vm3, %v1043_v40  ;;  %v1293_v44 = vsel %vm931_vm3, %v1288_v42, 0 }
 0x23e   : > { %2066 = vmatpush3.bf16.xpose.msra.mxu1 %v1173_v41  ;;  %2067 = vmatprep.mubr.msk.bf16.mxu1 %vm2595_vm0, %v2594_v0 }
 0x23f   : > { %2077 = vmatprep.subr.bf16.mxu1 %v2594_v0 }
 0x245   : > { %2068 = vmatmul.mubr.msk.bf16.vlgmr.msra.gmra.mrb[12].mxu1 %vm931_vm3, %v1163_v43 }
 0x246   : > { %2078 = vmatpush3.bf16.xpose.msra.mxu1 %v1293_v44  ;;  %2079 = vmatprep.mubr.msk.bf16.mxu1 %vm2595_vm0, %v2594_v0 }
 0x247   : > { %2089 = vmatprep.subr.bf16.mxu1 %v2594_v0 }
 0x24d   : > { %2080 = vmatmul.mubr.msk.bf16.vlgmr.msra.gmra.mrb[16].mxu1 %vm931_vm3, %v1283_v45 }
 0x24e   : > { %2093 = vmatprep.mubr.msk.bf16.mxu1 %vm2595_vm0, %v2594_v0 }
 0x29b   : > { %v972_v47 = vpop.f32.mrb[4].mxu1 }
 0x29c   : > { %v973_v48 = vadd.f32 %v1937_v46, %v972_v47  ;;  %v2045_v49 = vpop.f32.mrb[5].mxu1 }
 0x29d   : > { %v975_v50 = vpop.f32.mrb[6].mxu1 }
 0x29e   : > { %v2046_v51 = vpop.f32.mrb[7].mxu1  ;;  %v978_v52 = vsel %vm931_vm3, %v973_v48, -inf }
 0x29f   : > { %979 = vmax.xlane.f32.xlu0 %v978_v52 }
 0x310   : > { %v1089_v53 = vpop.f32.mrb[8].mxu1 }
 0x311   : > { %v1090_v54 = vadd.f32 %v1937_v46, %v1089_v53  ;;  %v2057_v55 = vpop.f32.mrb[9].mxu1 }
 0x312   : > { %v1092_v56 = vpop.f32.mrb[10].mxu1 }
 0x313   : > { %v2058_v57 = vpop.f32.mrb[11].mxu1  ;;  %v1095_v58 = vsel %vm931_vm3, %v1090_v54, -inf }
 0x314   : > { %1096 = vmax.xlane.f32.xlu1 %v1095_v58  ;;  %v2258_v58 = vld [vmem:[#allocation12] sm:$0xff]  }
 0x315   : > { %2090 = vmatpush3.bf16.msra.mxu1 %v2258_v58 }
 0x316   : > { %2091 = vmatprep.subr.bf16.mxu1 %v2594_v0 }
 0x318   : > { %v1209_v59 = vpop.f32.mrb[12].mxu1 }
 0x319   : > { %v1210_v60 = vadd.f32 %v1937_v46, %v1209_v59  ;;  %v2069_v61 = vpop.f32.mrb[13].mxu1 }
 0x31a   : > { %v1212_v62 = vpop.f32.mrb[14].mxu1 }
 0x31b   : > { %v2070_v63 = vpop.f32.mrb[15].mxu1  ;;  %v1215_v1 = vsel %vm931_vm3, %v1210_v60, -inf }
 0x31c   : > { %1216 = vmax.xlane.f32.xlu0 %v1215_v1  ;;  %v2259_v63 = vld [vmem:[#allocation12 + $0x8] sm:$0xff]  }
 0x31d   : > { %2092 = vmatpush3.bf16.msra.mxu1 %v2259_v63 }
 0x31e   : > { %2105 = vmatprep.subr.bf16.mxu1 %v2594_v0 }
 0x320   : > { %v1329_v2 = vpop.f32.mrb[16].mxu1 }
 0x321   : > { %v1330_v3 = vadd.f32 %v1937_v46, %v1329_v2  ;;  %v2081_v4 = vpop.f32.mrb[17].mxu1 }
 0x322   : > { %v1332_v5 = vpop.f32.mrb[18].mxu1 }
 0x323   : > { %v2082_v7 = vpop.f32.mrb[19].mxu1  ;;  %v1335_v8 = vsel %vm931_vm3, %v1330_v3, -inf }
 0x324   : > { %1336 = vmax.xlane.f32.xlu0 %v1335_v8 }
 0x32c   : > { %v980_v9 = vpop.xlane.xlu0 %979 }
 0x32d   : > { %v981_v10 = vsub.f32 %v973_v48, %v980_v9 }
 0x32f   : > { %v982_v11 = vmul.f32 1.442695, %v981_v10 }
 0x331   : > { %2266 = vpow2.f32 %v982_v11 }
 0x33b   : > { %v2267_v12 = vpop.eup %2266 }
 0x33c   : > { %v984_v13 = vsel %vm931_vm3, %v2267_v12, 0.0 }
 0x33d   : > { %985 = vadd.xlane.f32.xlu1 %v984_v13 }
 0x34e   : > { %1113 = vrot.lane.b32.xlu1 %v2255_v14, %s2597_s7 }
 0x3a1   : > { %v1097_v15 = vpop.xlane.xlu1 %1096 }
 0x3a2   : > { %v1098_v16 = vsub.f32 %v1090_v54, %v1097_v15 }
 0x3a4   : > { %v1099_v17 = vmul.f32 1.442695, %v1098_v16 }
 0x3a6   : > { %2268 = vpow2.f32 %v1099_v17  ;;  %v1955_v17 = vld [vmem:[#allocation13] ss:$0 sm:$0xff] }
 0x3a9   : > { %v1217_v18 = vpop.xlane.xlu0 %1216 }
 0x3aa   : > { %v1218_v19 = vsub.f32 %v1210_v60, %v1217_v18  ;;  %v854_v18 = vunpack.c.l.bf16 %v2965_v6  ;;  %v2260_v6 = vld [vmem:[%s3212_s12] sm:$0xff]  }
 0x3ac   : > { %v1219_v20 = vmul.f32 1.442695, %v1218_v19 }
 0x3ae   : > { %2270 = vpow2.f32 %v1219_v20 }
 0x3b0   : > { %v2269_v21 = vpop.eup %2268 }
 0x3b1   : > { %v1337_v22 = vpop.xlane.xlu0 %1336  ;;  %v1101_v23 = vsel %vm931_vm3, %v2269_v21, 0.0 }
 0x3b2   : > { %v1338_v24 = vsub.f32 %v1330_v3, %v1337_v22  ;;  %1102 = vadd.xlane.f32.xlu0 %v1101_v23 }
 0x3b4   : > { %v1339_v25 = vmul.f32 1.442695, %v1338_v24 }
 0x3b6   : > { %2272 = vpow2.f32 %v1339_v25 }
 0x3b8   : > { %v2271_v26 = vpop.eup %2270 }
 0x3b9   : > { %v1221_v27 = vsel %vm931_vm3, %v2271_v26, 0.0 }
 0x3ba   : > { %1222 = vadd.xlane.f32.xlu1 %v1221_v27 }
 0x3c0   : > { %v2273_v28 = vpop.eup %2272 }
 0x3c1   : > { %v1341_v29 = vsel %vm931_vm3, %v2273_v28, 0.0 }
 0x3c2   : > { %1342 = vadd.xlane.f32.xlu0 %v1341_v29 }
 0x3ca   : > { %v986_v31 = vpop.xlane.xlu1 %985 }
 0x3cb   : > { %2274 = vrcp.f32 %v986_v31  ;;  %1353 = vrot.lane.b32.xlu1 %v2256_v30, %s2598_s23  ;;  %v2261_v31 = vld [vmem:[%s3212_s12 + $0x8] sm:$0xff]   ;;  %s3288_s23 = sld [smem:[#allocation37_spill]] }
 0x3ce   : > { %v1114_v35 = vpop.permute.xlu1 %1113 }
 0x3cf   : > { %v1119_v37 = vsel %vm996_vm4, %v1114_v35, 0 }
 0x3d5   : > { %v2275_v32 = vpop.eup %2274 }
 0x3d6   : > { %v988_v33 = vmul.f32 %v2275_v32, %v2267_v12 }
 0x3d8   : > { %1233 = vrot.lane.b32.xlu0 %v2257_v34, %s2596_s0  ;;  %v989_v36 = vpack.c.bf16 %v988_v33, %v988_v33 }
 0x3da   : > { %2050 = vmatmul.mubr.msk.bf16.vlgmr.msra.gmra.mrb[8].mxu0 %vm931_vm3, %v989_v36  ;;  %991 = vst.msk [vmem:[%s3035_s26] sm:$0xf] %vm990_vm5, %v989_v36  ;;  %v1959_v36 = vld [vmem:[%s3210_s10] ss:$0 sm:$0xff] }
 0x3db   : > { %2060 = vmatpush3.bf16.msra.mxu0 %v1119_v37  ;;  %2061 = vmatprep.mubr.msk.bf16.mxu0 %vm2595_vm0, %v2594_v0 }
 0x3dc   : > { %2071 = vmatprep.subr.bf16.mxu0 %v2594_v0 }
 0x43f   : > { %v1103_v38 = vpop.xlane.xlu0 %1102 }
 0x440   : > { %2276 = vrcp.f32 %v1103_v38  ;;  %v1960_v38 = vld [vmem:[%s3211_s11] ss:$0 sm:$0xff] }
 0x447   : > { %v1223_v39 = vpop.xlane.xlu1 %1222 }
 0x448   : > { %2278 = vrcp.f32 %v1223_v39 }
 0x44a   : > { %v2277_v40 = vpop.eup %2276 }
 0x44b   : > { %v1105_v41 = vmul.f32 %v2277_v40, %v2269_v21  ;;  %v1354_v48 = vpop.permute.xlu1 %1353 }
 0x44c   : > { %v1359_v50 = vsel %vm996_vm4, %v1354_v48, 0 }
 0x44d   : > { %v1106_v42 = vpack.c.bf16 %v1105_v41, %v1105_v41 }
 0x44f   : > { %2062 = vmatmul.mubr.msk.bf16.vlgmr.msra.gmra.mrb[12].mxu0 %vm931_vm3, %v1106_v42  ;;  %v1343_v43 = vpop.xlane.xlu0 %1342  ;;  %1942 = vst.msk [vmem:[%s3035_s26 + $0x4] sm:$0xf] %vm990_vm5, %v1106_v42  ;;  %v2262_v42 = vld [vmem:[%s3286_s5] sm:$0xff]  }
 0x450   : > { %2280 = vrcp.f32 %v1343_v43  ;;  %2073 = vmatprep.mubr.msk.bf16.mxu0 %vm2595_vm0, %v2594_v0  ;;  %v2263_v43 = vld [vmem:[%s3286_s5 + $0x8] sm:$0xff]  }
 0x452   : > { %v2279_v44 = vpop.eup %2278 }
 0x453   : > { %v1225_v45 = vmul.f32 %v2279_v44, %v2271_v26  ;;  %v1234_v46 = vpop.permute.xlu0 %1233  ;;  %v2264_v44 = vld [vmem:[%s3286_s5 + $0x10] sm:$0xff]  }
 0x454   : > { %v1239_v47 = vsel %vm996_vm4, %v1234_v46, 0  ;;  %v1961_v46 = vld [vmem:[%s3287_s2] ss:$0 sm:$0xff] }
 0x455   : > { %2072 = vmatpush3.bf16.msra.mxu0 %v1239_v47  ;;  %v1226_v49 = vpack.c.bf16 %v1225_v45, %v1225_v45  ;;  %v2265_v45 = vld [vmem:[%s3286_s5 + $0x18] sm:$0xff]  }
 0x456   : > { %2083 = vmatprep.subr.bf16.mxu0 %v2594_v0 }
 0x457   : > { %1947 = vst.msk [vmem:[%s3035_s26 + $0x8] sm:$0xf] %vm990_vm5, %v1226_v49 }
 0x458   : > { %2074 = vmatmul.mubr.msk.bf16.vlgmr.msra.gmra.mrb[16].mxu0 %vm931_vm3, %v1226_v49 }
 0x459   : > { %2084 = vmatpush3.bf16.msra.mxu0 %v1359_v50  ;;  %2085 = vmatprep.mubr.msk.bf16.mxu0 %vm2595_vm0, %v2594_v0 }
 0x45a   : > { %v2281_v51 = vpop.eup %2280  ;;  %2097 = vmatprep.subr.bf16.mxu0 %v2594_v0 }
 0x45b   : > { %v1345_v52 = vmul.f32 %v2281_v51, %v2273_v28 }
 0x45d   : > { %v1346_v53 = vpack.c.bf16 %v1345_v52, %v1345_v52 }
 0x45f   : > { %1952 = vst.msk [vmem:[%s3035_s26 + $0xc] sm:$0xf] %vm990_vm5, %v1346_v53  ;;  %s2464_s26 = scalar_lea.vmem %s2463_s14, 512 }
 0x460   : > { %2086 = vmatmul.mubr.msk.bf16.vlgmr.msra.gmra.mrb[20].mxu0 %vm931_vm3, %v1346_v53 }
 0x461   : > { %2101 = vmatprep.mubr.msk.bf16.mxu0 %vm2595_vm0, %v2594_v0  ;;  %2098 = vmatpush3.bf16.msra.mxu0 %v2260_v6 }
 0x462   : > { %2099 = vmatprep.subr.bf16.mxu0 %v2594_v0 }
 0x465   : > { %2100 = vmatpush3.bf16.msra.mxu0 %v2261_v31 }
 0x4ad   : > { %v1034_v54 = vpop.f32.mrb[8].mxu0 }
 0x4ae   : > { %v2051_v55 = vpop.f32.mrb[9].mxu0 }
 0x4af   : > { %v1037_v56 = vpop.f32.mrb[10].mxu0 }
 0x4b0   : > { %v2052_v57 = vpop.f32.mrb[11].mxu0 }
 0x522   : > { %v1155_v59 = vpop.f32.mrb[12].mxu0 }
 0x523   : > { %1402 = vrot.lane.b32.xlu1 %v1155_v59, %s2599_s29  ;;  %v2063_v60 = vpop.f32.mrb[13].mxu0  ;;  %s3114_s29 = scalar_lea.hbm %s3289_s25, %s1980_s16 }
 0x524   : > { %v1158_v61 = vpop.f32.mrb[14].mxu0 }
 0x525   : > { %v2064_v62 = vpop.f32.mrb[15].mxu0  ;;  %v1965_v61 = vld [vmem:[%s3288_s23] ss:$0 sm:$0xff] }
 0x52b   : > { %v1275_v1 = vpop.f32.mrb[16].mxu0 }
 0x52c   : > { %1406 = vrot.lane.b32.xlu0 %v1275_v1, %s2600_s19  ;;  %v2075_v2 = vpop.f32.mrb[17].mxu0  ;;  %s1713_s19 = scalar_lea.sflag [#allocation17], %s3029_s28 }
 0x52d   : > { %v1278_v3 = vpop.f32.mrb[18].mxu0 }
 0x52e   : > { %v2076_v4 = vpop.f32.mrb[19].mxu0 }
 0x533   : > { %v1395_v5 = vpop.f32.mrb[20].mxu0 }
 0x534   : > { %1410 = vrot.lane.b32.xlu1 %v1395_v5, %s2601_s1  ;;  %v2087_v7 = vpop.f32.mrb[21].mxu0  ;;  %s2458_s1 = scalar_lea.vmem %s3109_s15, 256 }
 0x535   : > { %v1398_v8 = vpop.f32.mrb[22].mxu0  ;;  %p2459_p10 = scmp.ne.s32.totalorder %s3109_s15, %s2458_s1  ;;  %p2466_p3 = scmp.lt.s32.totalorder %s2464_s26, %s2458_s1 }
 0x536   : > { %v2088_v9 = vpop.f32.mrb[23].mxu0 }
 0x537   : > { %p2460_p0 = pnand %p2459_p10, %p3290_p13  ;;  %p2467_p2 = por %p2466_p3, %p2465_p4 }
 0x539   : > { %p2461_p6 = pneg %p2460_p0 }
 0x53b   : > { %p2468_p8 = pnand %p2467_p2, %p2461_p6 }
 0x595   : > { %v1403_v10 = vpop.permute.xlu1 %1402 }
 0x596   : > { %v1413_v12 = vsel %vm931_vm3, %v1034_v54, %v1403_v10 }
 0x59e   : > { %v1407_v11 = vpop.permute.xlu0 %1406 }
 0x59f   : > { %v1415_v13 = vsel %vm1414_vm6, %v1413_v12, %v1407_v11 }
 0x5a6   : > { %v1411_v14 = vpop.permute.xlu1 %1410 }
 0x5a7   : > { %v1417_v15 = vsel %vm1416_vm7, %v1415_v13, %v1411_v14 }
 0x5a8   : > { %v1418_v16 = vpack.c.bf16 %v1417_v15, %v1417_v15 }
 0x5aa   : > { %2094 = vmatmul.mubr.msk.bf16.vlgmr.msra.gmra.mrb[20].mxu1 %vm736_vm1, %v1418_v16 }
 0x5ab   : > { %2113 = vmatprep.mubr.msk.bf16.mxu1 %vm2595_vm0, %v2594_v0  ;;  %2106 = vmatpush3.bf16.msra.mxu1 %v2262_v42 }
 0x5ac   : > { %2107 = vmatprep.subr.bf16.mxu1 %v2594_v0 }
 0x5af   : > { %2108 = vmatpush3.bf16.msra.mxu1 %v2263_v43 }
 0x5b0   : > { %2109 = vmatprep.subr.bf16.mxu1 %v2594_v0 }
 0x5b3   : > { %2110 = vmatpush3.bf16.msra.mxu1 %v2264_v44 }
 0x5b4   : > { %2111 = vmatprep.subr.bf16.mxu1 %v2594_v0 }
 0x5b7   : > { %2112 = vmatpush3.bf16.msra.mxu1 %v2265_v45 }
 0x67d   : > { %v1479_v19 = vpop.f32.mrb[20].mxu1 }
 0x67e   : > { %v1480_v20 = vadd.f32 %v1955_v17, %v1479_v19  ;;  %v2095_v21 = vpop.f32.mrb[21].mxu1 }
 0x67f   : > { %v1482_v22 = vpop.f32.mrb[22].mxu1 }
 0x680   : > { %v2096_v23 = vpop.f32.mrb[23].mxu1  ;;  %v1485_v24 = vadd.f32 %v1480_v20, %v854_v18 }
 0x682   : > { %v1488_v25 = vsel %vm736_vm1, %v1485_v24, 0.0 }
 0x683   : > { %1489 = vadd.xlane.f32.xlu0 %v1488_v25 }
 0x710   : > { %v1490_v26 = vpop.xlane.xlu0 %1489 }
 0x711   : > { %v1492_v27 = vmul.f32 0.03125, %v1490_v26 }
 0x713   : > { %v1493_v28 = vsub.f32 %v1485_v24, %v1492_v27 }
 0x715   : > { %v1494_v29 = vmul.f32 %v1493_v28, %v1493_v28 }
 0x717   : > { %v1495_v30 = vsel %vm736_vm1, %v1494_v29, 0.0 }
 0x718   : > { %1496 = vadd.xlane.f32.xlu1 %v1495_v30 }
 0x7a5   : > { %v1497_v32 = vpop.xlane.xlu1 %1496 }
 0x7a6   : > { %v1498_v33 = vmul.f32 0.03125, %v1497_v32 }
 0x7a8   : > { %v1499_v34 = vadd.f32 1e-12, %v1498_v33 }
 0x7aa   : > { %2282 = vrsqrt.f32 %v1499_v34 }
 0x7b4   : > { %v2283_v35 = vpop.eup %2282 }
 0x7b5   : > { %v1501_v37 = vmul.f32 %v2283_v35, %v1493_v28 }
 0x7b7   : > { %v1508_v39 = vmul.f32 %v1959_v36, %v1501_v37 }
 0x7b9   : > { %v1515_v40 = vadd.f32 %v1960_v38, %v1508_v39 }
 0x7bb   : > { %v1516_v41 = vpack.c.bf16 %v1515_v40, %v1515_v40 }
 0x7bd   : > { %2102 = vmatmul.mubr.msk.bf16.vlgmr.msra.gmra.mrb[24].mxu0 %vm736_vm1, %v1516_v41 }
 0x890   : > { %v1577_v47 = vpop.f32.mrb[24].mxu0 }
 0x891   : > { %v1578_v48 = vadd.f32 %v1961_v46, %v1577_v47  ;;  %v2103_v49 = vpop.f32.mrb[25].mxu0 }
 0x892   : > { %v1580_v50 = vpop.f32.mrb[26].mxu0 }
 0x893   : > { %v1584_v51 = vmul.f32 %v1578_v48, %v1578_v48  ;;  %v2104_v52 = vpop.f32.mrb[27].mxu0  ;;  %v1583_v57 = vmul.f32 0.5, %v1578_v48 }
 0x895   : > { %v1585_v53 = vmul.f32 %v1584_v51, %v1578_v48 }
 0x897   : > { %v1586_v54 = vmul.f32 0.044715, %v1585_v53 }
 0x899   : > { %v1587_v55 = vadd.f32 %v1586_v54, %v1578_v48 }
 0x89b   : > { %v1588_v56 = vmul.f32 0.7978846, %v1587_v55 }
 0x89d   : > { %2284 = vtanh.f32 %v1588_v56 }
 0x8a7   : > { %v2285_v0 = vpop.eup %2284 }
 0x8a8   : > { %v1590_v58 = vadd.f32 1.0, %v2285_v0 }
 0x8aa   : > { %v1591_v59 = vmul.f32 %v1590_v58, %v1583_v57 }
 0x8ac   : > { %v1592_v60 = vpack.c.bf16 %v1591_v59, %v1591_v59 }
 0x8ae   : > { %2114 = vmatmul.mubr.msk.bf16.vlgmr.msra.gmra.mrb[24].mxu1 %vm1632_vm8, %v1592_v60 }
 0x981   : > { %v1670_v62 = vpop.f32.mrb[24].mxu1 }
 0x982   : > { %v1671_v63 = vadd.f32 %v1965_v61, %v1670_v62  ;;  %v2115_v1 = vpop.f32.mrb[25].mxu1 }
 0x983   : > { %v1673_v2 = vpop.f32.mrb[26].mxu1 }
 0x984   : > { %v2116_v3 = vpop.f32.mrb[27].mxu1  ;;  %v1676_v4 = vadd.f32 %v1671_v63, %v1515_v40 }
 0x986   : > { %v1679_v5 = vsel %vm736_vm1, %v1676_v4, 0.0 }
 0x987   : > { %1680 = vadd.xlane.f32.xlu0 %v1679_v5 }
 0xa14   : > { %v1681_v7 = vpop.xlane.xlu0 %1680 }
 0xa15   : > { %v1682_v8 = vmul.f32 0.03125, %v1681_v7 }
 0xa17   : > { %v1683_v9 = vsub.f32 %v1676_v4, %v1682_v8 }
 0xa19   : > { %v1684_v10 = vmul.f32 %v1683_v9, %v1683_v9 }
 0xa1b   : > { %v1685_v11 = vsel %vm736_vm1, %v1684_v10, 0.0 }
 0xa1c   : > { %1686 = vadd.xlane.f32.xlu0 %v1685_v11 }
 0xa1d   : > { %2471 = shalt.err (!%p2468_p8)
}
 0xa1e   : > { %s2472_s17 = scalar_lea.hbm %s3114_s29, 256  ;;  %s2476_s7 = scalar_lea.hbm %s3289_s25, 512 }
 0xa1f   : > { %p2473_p1 = scmp.ne.s32.totalorder %s3114_s29, %s2472_s17  ;;  %p2477_p7 = scmp.lt.u32.totalorder %s3114_s29, %s3289_s25 }
 0xa20   : > { %p2478_p5 = scmp.lt.u32.totalorder %s2476_s7, %s2472_s17  ;;  %p2480_p10 = scmp.lt.u32.totalorder %s2472_s17, %s3114_s29 }
 0xa21   : > { %p2474_p11 = pnand %p2473_p1, %p3290_p13 }
 0xa22   : > { %p2479_p12 = por %p2478_p5, %p2477_p7 }
 0xa23   : > { %p2475_p9 = pneg %p2474_p11 }
 0xa24   : > { %p2481_p0 = por %p2480_p10, %p2479_p12 }
 0xa26   : > { %p2482_p6 = pnand %p2481_p0, %p2475_p9 }
 0xa28   : > { %2485 = shalt.err (!%p2482_p6)
}
 0xa29   : > { %s2603_s20 = smov 64   ;;  %s2604_s3 = smov 4  }
 0xa2a   : > { %2140 = dma.vmem_to_hbm [thread:$0]  (%p3290_p13), %s3109_s15, 256, %s3114_s29, %s1713_s19, %s2603_s20, %s2603_s20, %s2604_s3  }
 0xa2b   : > { %s1923_s1 = sshll.u32 %s3029_s28, 3  ;;  %s3291_s26 = sld [smem:[#allocation38_spill]] }
 0xa2c   : > { %s3292_s0 = sld [smem:[#allocation39_spill]]  ;;  %s1975_s7 = sshll.u32 %s2576_s21, 7 }
 0xa2d   : > { %s696_s23 = scalar_lea.vmem [#allocation15], %s1923_s1  ;;  %s3293_s16 = sld [smem:[#allocation40_spill]] }
 0xa2e   : > { %s1727_s15 = sshll.u32 %s696_s23, 4  ;;  %s1708_s3 = scalar_lea.sflag [#allocation6], %s3029_s28  ;;  %s3153_s15 = int_to_ptr.vmem [resolvable:$true] %s1727_s15 }
 0xa2f   : > { %s2486_s18 = scalar_lea.vmem %s3153_s15, 128  ;;  %s2605_s21 = smov [#allocation15]  }
 0xa30   : > { %p2487_p4 = scmp.ne.s32.totalorder %s3153_s15, %s2486_s18  ;;  %s2490_s1 = sshll.u32 %s2605_s21, 4  ;;  %s2491_s1 = int_to_ptr.vmem [resolvable:$false] %s2490_s1 }
 0xa31   : > { %v1971_v16 = vld [vmem:[%s3291_s26] ss:$0 sm:$0xff]  ;;  %s2492_s14 = scalar_lea.vmem %s2491_s1, 256  ;;  %p2493_p8 = scmp.lt.s32.totalorder %s3153_s15, %s2491_s1 }
 0xa32   : > { %v1972_v18 = vld [vmem:[%s3292_s0] ss:$0 sm:$0xff]  ;;  %p2488_p3 = pnand %p2487_p4, %p3290_p13  ;;  %p2494_p1 = scmp.lt.s32.totalorder %s2492_s14, %s2486_s18 }
 0xa33   : > { %s3151_s20 = scalar_lea.hbm %s3293_s16, %s1975_s7 }
 0xa34   : > { %p2489_p2 = pneg %p2488_p3  ;;  %p2495_p11 = por %p2494_p1, %p2493_p8 }
 0xa36   : > { %p2496_p9 = pnand %p2495_p11, %p2489_p2 }
 0xaa9   : > { %v1687_v12 = vpop.xlane.xlu0 %1686 }
 0xaaa   : > { %v1688_v13 = vmul.f32 0.03125, %v1687_v12 }
 0xaac   : > { %v1689_v14 = vadd.f32 1e-12, %v1688_v13 }
 0xaae   : > { %2286 = vrsqrt.f32 %v1689_v14 }
 0xab8   : > { %v2287_v15 = vpop.eup %2286 }
 0xab9   : > { %v1691_v17 = vmul.f32 %v2287_v15, %v1683_v9 }
 0xabb   : > { %v1698_v19 = vmul.f32 %v1971_v16, %v1691_v17 }
 0xabd   : > { %v1705_v20 = vadd.f32 %v1972_v18, %v1698_v19 }
 0xabf   : > { %1706 = vst.msk [vmem:[%s696_s23] sm:$0xff] %vm736_vm1, %v1705_v20 }
 0xac0   : > { %2499 = shalt.err (!%p2496_p9)
}
 0xac1   : > { %s2500_s28 = scalar_lea.hbm %s3151_s20, 128  ;;  %s2504_s2 = scalar_lea.hbm %s3293_s16, 256 }
 0xac2   : > { %p2501_p7 = scmp.ne.s32.totalorder %s3151_s20, %s2500_s28  ;;  %p2505_p10 = scmp.lt.u32.totalorder %s3151_s20, %s3293_s16 }
 0xac3   : > { %p2506_p0 = scmp.lt.u32.totalorder %s2504_s2, %s2500_s28  ;;  %p2508_p4 = scmp.lt.u32.totalorder %s2500_s28, %s3151_s20 }
 0xac4   : > { %p2502_p5 = pnand %p2501_p7, %p3290_p13 }
 0xac5   : > { %p2507_p6 = por %p2506_p0, %p2505_p10 }
 0xac6   : > { %p2503_p12 = pneg %p2502_p5 }
 0xac7   : > { %p2509_p3 = por %p2508_p4, %p2507_p6 }
 0xac9   : > { %p2510_p2 = pnand %p2509_p3, %p2503_p12 }
 0xacb   : > { %2513 = shalt.err (!%p2510_p2)
}
 0xacc   : > { %2139 = dma.vmem_to_hbm [thread:$0]  (%p3290_p13), %s3153_s15, 128, %s3151_s20, %s1708_s3  }
 0xacd PF: > { %s3294_s23 = sld [smem:[#allocation24_spill]]  ;;  %p2179_p8 = scmp.ge.s32.totalorder %s2584_s22, 2 }
 0xace   : > { %p3295_p1 = scmp.ne.s32.totalorder %s3272_s13, 0 }
 0xad0   : > { %p2163_p11 = pnand %p2179_p8, %p3295_p1 }
 0xad3   : > { %s1756_s29 = sand.u32 1, %s3294_s23  }
 0xad4   : > { %s1757_s19 = scalar_lea.sflag [#allocation6], %s1756_s29 }
 0xad5   : > { %2555 = dma.done.wait (!%p2163_p11), %s1757_s19, 128  }
 0xad6   : > { %2557 = vsyncadd (!%p2163_p11), %s1757_s19, 4294967168  ;;  %s1766_s18 = scalar_lea.sflag [#allocation17], %s1756_s29 }
 0xad7   : > { %2559 = dma.done.wait (!%p2163_p11), %s1766_s18, 256  }
 0xad8   : > { %2561 = vsyncadd (!%p2163_p11), %s1766_s18, 4294967040  ;;  %s40_s22 = sadd.s32 1, %s2584_s22   ;;  %s3296_s27 = sld [smem:[#allocation25_spill]] }
 0xad9   : > { %p37_p9 = scmp.ge.s32.totalorder %s40_s22, 4   ;;  %s3297_s20 = sld [smem:[#allocation28_spill]] }
 0xada   : > { %s3298_s21 = sld [smem:[#allocation26_spill]]  ;;  %s3299_s1 = sld [smem:[#allocation27_spill]] }
 0xadb   : > { %s3300_s0 = smov %s2568_s30  ;;  %39 = sbr.rel (!%p37_p9) target bundleno = 24 (0x18), region = 178 }
 0xade   : > { %s3301_s30 = smov %s3296_s27 }
 0xae2   :  { %1771 = vsyncpa [#allocation5], 1 }
 0xae3   :  { %1773 = vsyncpa [#allocation5 + $0x1], 1 }
 0xae4   :  { %1774 = vsyncpa [#allocation8], 1 }
 0xae5   :  { %1775 = vsyncpa [#allocation11], 1 }
 0xae6   :  { %1776 = vsyncpa [#allocation14], 1 }
 0xae7   :  { %1777 = vsyncpa [#allocation6], 1 }
 0xae8   :  { %1779 = vsyncpa [#allocation6 + $0x1], 1 }
 0xae9   :  { %1780 = vsyncpa [#allocation17], 1 }
 0xaea   :  { %1782 = vsyncpa [#allocation17 + $0x1], 1 }

</bundles_post_ra>
